<compile_context>
chip_gen: v6e
topology: v6e:2x2x1
jax: 0.10.0
libtpu: 0.0.40
codegen_flags: <defaults>
</compile_context>

<pallas_src>
import functools
import jax
import jax.numpy as jnp
from jax.experimental import pallas as pl
from jax.experimental.pallas import tpu as pltpu


# ----------------------------------------------------------------------------
# Padding helpers (wrapper side)
# ----------------------------------------------------------------------------
def _round_up(v, m=128):
    return ((v + m - 1) // m) * m


def _pad2(x, rows, cols):
    return jnp.pad(x, ((0, rows - x.shape[0]), (0, cols - x.shape[1])))


def _pad_row(v, cols):
    v = v.reshape(1, -1)
    return jnp.pad(v, ((0, 0), (0, cols - v.shape[1])))


# ----------------------------------------------------------------------------
# Fused kernel: all GCN layers (conv -> +bias -> ReLU -> LayerNorm) + post_mp
# (3 Linear layers) + log_softmax.  Dropout is identity (eval semantics).
# ----------------------------------------------------------------------------
def _fused_gnn_kernel(*refs, num_layers, hidden_valid, out_valid, eps=1e-5):
    n_conv = num_layers + 1
    n_in = 2 + 4 * n_conv + 6
    in_refs, out_refs = refs[:n_in], refs[n_in:]

    a_ref, x_ref = in_refs[0], in_refs[1]
    conv_refs = [in_refs[2 + 4 * l: 2 + 4 * (l + 1)] for l in range(n_conv)]
    w1_ref, b1_ref, w2_ref, b2_ref, w3_ref, b3_ref = in_refs[2 + 4 * n_conv:]

    emb_ref = out_refs[0]                      # pre-activation of last conv
    relu_refs = out_refs[1:1 + n_conv]         # relu(conv_l) for every layer
    logprob_ref = out_refs[1 + n_conv]

    hp = emb_ref.shape[1]
    hcol = jax.lax.broadcasted_iota(jnp.int32, (1, hp), 1)
    hmask = (hcol < hidden_valid).astype(jnp.float32)
    inv_h = jnp.float32(1.0 / hidden_valid)

    a = a_ref[...]          # bf16 [N, N], VMEM-resident and reused by every layer
    h = x_ref[...]          # f32 activations, never written back between layers

    for l in range(n_conv):                       # static unroll over layers
        w_ref, b_ref, g_ref, beta_ref = conv_refs[l]
        # GCNConv: A_hat @ (X @ W) + b   (bias after aggregation, like PyG)
        xw = jnp.dot(h, w_ref[...], preferred_element_type=jnp.float32)
        conv = jnp.dot(a, xw.astype(jnp.bfloat16),
                       preferred_element_type=jnp.float32) + b_ref[...]
        r = jnp.maximum(conv, 0.0)                # ReLU
        relu_refs[l][...] = r                     # embeddings entry (lane-dense)
        if l == n_conv - 1:
            emb_ref[...] = conv                   # `emb` = pre-activation of last conv
        # masked LayerNorm over the valid hidden columns (padded cols stay 0)
        mean = jnp.sum(r, axis=-1, keepdims=True) * inv_h
        c = (r - mean) * hmask
        var = jnp.sum(c * c, axis=-1, keepdims=True) * inv_h
        h = c * jax.lax.rsqrt(var + eps) * g_ref[...] + beta_ref[...]
        # TODO(synk): F.dropout with training=True not reproduced; treated as identity.

    # post_mp: 3 stacked Linear layers (no nonlinearity in the reference)
    h1 = jnp.dot(h, w1_ref[...], preferred_element_type=jnp.float32) + b1_ref[...]
    h2 = jnp.dot(h1, w2_ref[...], preferred_element_type=jnp.float32) + b2_ref[...]
    h3 = jnp.dot(h2, w3_ref[...], preferred_element_type=jnp.float32) + b3_ref[...]

    # masked log_softmax over the valid output classes
    op = logprob_ref.shape[1]
    ocol = jax.lax.broadcasted_iota(jnp.int32, (1, op), 1)
    logits = jnp.where(ocol < out_valid, h3, jnp.float32(-1e30))
    m = jnp.max(logits, axis=-1, keepdims=True)
    s = logits - m
    lse = jnp.log(jnp.sum(jnp.exp(s), axis=-1, keepdims=True))
    logprob_ref[...] = s - lse


# ----------------------------------------------------------------------------
# Wrapper: pad to lane-dense widths, single pallas_call, slice back.
# ----------------------------------------------------------------------------
def gnn_forward(params, x, a_hat, num_layers):
    n, input_dim = x.shape
    hidden_dim = params["conv1"][0].shape[1]
    w1, b1, w2, b2, w3, b3 = params["post_mp"]
    dense_dim, dense2_dim, output_dim = w1.shape[1], w2.shape[1], w3.shape[1]

    ip, hp = _round_up(input_dim), _round_up(hidden_dim)
    dp, d2p, op = _round_up(dense_dim), _round_up(dense2_dim), _round_up(output_dim)

    a_bf16 = a_hat.astype(jnp.bfloat16)           # halves adjacency HBM traffic
    x_p = _pad2(x, n, ip)

    conv_ws = [params["conv1"]] + list(params["convs"])
    lns = [params["norm1"]] + list(params["lns"])
    inputs = [a_bf16, x_p]
    fin = ip
    for (w, b), (g, beta) in zip(conv_ws, lns):
        inputs += [_pad2(w, fin, hp), _pad_row(b, hp),
                   _pad_row(g, hp), _pad_row(beta, hp)]
        fin = hp
    inputs += [_pad2(w1, hp, dp), _pad_row(b1, dp),
               _pad2(w2, dp, d2p), _pad_row(b2, d2p),
               _pad2(w3, d2p, op), _pad_row(b3, op)]

    n_conv = num_layers + 1
    out_shape = ([jax.ShapeDtypeStruct((n, hp), jnp.float32)]              # emb
                 + [jax.ShapeDtypeStruct((n, hp), jnp.float32)] * n_conv   # relus
                 + [jax.ShapeDtypeStruct((n, op), jnp.float32)])           # logprob
    vmem = pl.BlockSpec(memory_space=pltpu.MemorySpace.VMEM)

    # Advisory cost estimate for the XLA scheduler.
    flops = 0
    f_in = ip
    for _ in range(n_conv):
        flops += 2 * n * f_in * hp + 2 * n * n * hp
        f_in = hp
    flops += 2 * n * (hp * dp + dp * d2p + d2p * op)
    transcendentals = n * n_conv + n * op + n           # rsqrt + exp + log
    bytes_accessed = (int(a_bf16.size) * 2 + int(x_p.size) * 4
                      + sum(int(v.size) * 4 for v in inputs[2:])
                      + (n * hp * (n_conv + 1) + n * op) * 4)

    kernel = functools.partial(_fused_gnn_kernel, num_layers=num_layers,
                               hidden_valid=hidden_dim, out_valid=output_dim)
    outs = pl.pallas_call(
        kernel,
        out_shape=tuple(out_shape),
        in_specs=[vmem] * len(inputs),
        out_specs=tuple([vmem] * len(out_shape)),
        cost_estimate=pl.CostEstimate(flops=flops,
                                      transcendentals=transcendentals,
                                      bytes_accessed=bytes_accessed),
    )(*inputs)

    emb = outs[0][:, :hidden_dim]
    embeddings = [x] + [r[:, :hidden_dim] for r in outs[1:1 + n_conv]]
    logprob = outs[1 + n_conv][:, :output_dim]
    return emb, embeddings, logprob


# ----------------------------------------------------------------------------
# Dense symmetric GCN normalization of edge_index (plain JAX, done once)
# ----------------------------------------------------------------------------
def build_norm_adj(edge_index, num_nodes):
    src, dst = edge_index[0], edge_index[1]
    a = jnp.zeros((num_nodes, num_nodes), jnp.float32)
    a = a.at[dst, src].set(1.0)                         # message src -> dst
    a = a + jnp.eye(num_nodes, dtype=jnp.float32)       # self loops
    deg = jnp.sum(a, axis=1)
    dinv = jax.lax.rsqrt(jnp.maximum(deg, 1e-12))
    return dinv[:, None] * a * dinv[None, :]


def init_params(key, input_dim, hidden_dim, dense_hidden_dim, output_dim,
                num_layers):
    def dense(key, fin, fout):
        kw, kb = jax.random.split(key)
        lim = 1.0 / jnp.sqrt(fin)
        w = jax.random.uniform(kw, (fin, fout), jnp.float32, -lim, lim)
        b = jax.random.uniform(kb, (fout,), jnp.float32, -lim, lim)
        return w, b

    keys = jax.random.split(key, 3 + num_layers + 3)
    params = {}
    params["conv1"] = dense(keys[0], input_dim, hidden_dim)
    params["norm1"] = (jnp.ones((hidden_dim,), jnp.float32),
                       jnp.zeros((hidden_dim,), jnp.float32))
    params["convs"] = []
    params["lns"] = []
    for l in range(num_layers):
        params["convs"].append(dense(keys[1 + l], hidden_dim, hidden_dim))
        params["lns"].append((jnp.ones((hidden_dim,), jnp.float32),
                              jnp.zeros((hidden_dim,), jnp.float32)))
    w1, b1 = dense(keys[1 + num_layers], hidden_dim, dense_hidden_dim)
    w2, b2 = dense(keys[2 + num_layers], dense_hidden_dim, dense_hidden_dim // 2)
    w3, b3 = dense(keys[3 + num_layers], dense_hidden_dim // 2, output_dim)
    params["post_mp"] = (w1, b1, w2, b2, w3, b3)
    return params


# ----------------------------------------------------------------------------
# Pure-JAX reference (same bf16 adjacency quantization as the kernel)
# ----------------------------------------------------------------------------
def reference_forward(params, x, a_hat_bf16, num_layers, eps=1e-5):
    a = a_hat_bf16.astype(jnp.float32)
    conv_ws = [params["conv1"]] + list(params["convs"])
    lns = [params["norm1"]] + list(params["lns"])
    h = x
    embeddings = [x]
    emb = None
    for (w, b), (g, beta) in zip(conv_ws, lns):
        xw = h @ w
        conv = a @ (xw.astype(jnp.bfloat16).astype(jnp.float32)) + b
        emb = conv
        r = jnp.maximum(conv, 0.0)
        embeddings.append(r)
        mean = jnp.mean(r, axis=-1, keepdims=True)
        var = jnp.mean((r - mean) ** 2, axis=-1, keepdims=True)
        h = (r - mean) * jax.lax.rsqrt(var + eps) * g + beta
    w1, b1, w2, b2, w3, b3 = params["post_mp"]
    h3 = ((h @ w1 + b1) @ w2 + b2) @ w3 + b3
    return emb, embeddings, jax.nn.log_softmax(h3, axis=-1)


if __name__ == "__main__":
    # Small deterministic configuration (heads=1, task='node', gnn_type='GCNConv',
    # edge_attr=False, dropout treated as identity).
    num_nodes = 16
    input_dim = 16
    hidden_dim = 32
    dense_hidden_dim = 32
    output_dim = 8
    num_layers = 2

    key = jax.random.PRNGKey(0)
    kx, kp = jax.random.split(key)
    x = jax.random.normal(kx, (num_nodes, input_dim), jnp.float32)

    # Deterministic undirected ring graph (both edge directions, no self loops).
    idx = jnp.arange(num_nodes)
    src = jnp.concatenate([idx, (idx + 1) % num_nodes])
    dst = jnp.concatenate([(idx + 1) % num_nodes, idx])
    edge_index = jnp.stack([src, dst], axis=0)

    a_hat = build_norm_adj(edge_index, num_nodes)
    params = init_params(kp, input_dim, hidden_dim, dense_hidden_dim,
                         output_dim, num_layers)

    emb, embeddings, logprob = gnn_forward(params, x, a_hat, num_layers)
    jax.block_until_ready((emb, logprob))

    # structural checks
    assert emb.shape == (num_nodes, hidden_dim)
    assert logprob.shape == (num_nodes, output_dim)
    assert len(embeddings) == 2 + num_layers
    assert bool(jnp.allclose(jnp.sum(jnp.exp(logprob), axis=1), 1.0, atol=1e-4))

    # numerical check against pure-JAX reference
    emb_r, embs_r, logprob_r = reference_forward(
        params, x, a_hat.astype(jnp.bfloat16), num_layers)
    assert bool(jnp.allclose(emb, emb_r, atol=1e-1, rtol=1e-1))
    assert bool(jnp.allclose(logprob, logprob_r, atol=1e-1, rtol=1e-1))
    for got, want in zip(embeddings[1:], embs_r[1:]):
        assert bool(jnp.allclose(got, want, atol=1e-1, rtol=1e-1))

    print("KERNEL_OK")
</pallas_src>

<mosaic_0001>
module attributes {stable_mosaic.version = 11 : i64} {
  func.func @_fused_gnn_kernel(%arg0: memref<16x16xbf16, #tpu.memory_space<vmem>>, %arg1: memref<16x128xf32, #tpu.memory_space<vmem>>, %arg2: memref<128x128xf32, #tpu.memory_space<vmem>>, %arg3: memref<1x128xf32, #tpu.memory_space<vmem>>, %arg4: memref<1x128xf32, #tpu.memory_space<vmem>>, %arg5: memref<1x128xf32, #tpu.memory_space<vmem>>, %arg6: memref<128x128xf32, #tpu.memory_space<vmem>>, %arg7: memref<1x128xf32, #tpu.memory_space<vmem>>, %arg8: memref<1x128xf32, #tpu.memory_space<vmem>>, %arg9: memref<1x128xf32, #tpu.memory_space<vmem>>, %arg10: memref<128x128xf32, #tpu.memory_space<vmem>>, %arg11: memref<1x128xf32, #tpu.memory_space<vmem>>, %arg12: memref<1x128xf32, #tpu.memory_space<vmem>>, %arg13: memref<1x128xf32, #tpu.memory_space<vmem>>, %arg14: memref<128x128xf32, #tpu.memory_space<vmem>>, %arg15: memref<1x128xf32, #tpu.memory_space<vmem>>, %arg16: memref<128x128xf32, #tpu.memory_space<vmem>>, %arg17: memref<1x128xf32, #tpu.memory_space<vmem>>, %arg18: memref<128x128xf32, #tpu.memory_space<vmem>>, %arg19: memref<1x128xf32, #tpu.memory_space<vmem>>, %arg20: memref<16x128xf32, #tpu.memory_space<vmem>>, %arg21: memref<16x128xf32, #tpu.memory_space<vmem>>, %arg22: memref<16x128xf32, #tpu.memory_space<vmem>>, %arg23: memref<16x128xf32, #tpu.memory_space<vmem>>, %arg24: memref<16x128xf32, #tpu.memory_space<vmem>>) attributes {dimension_semantics = [], scalar_prefetch = 0 : i64, scratch_operands = 0 : i64, tpu.core_type = #tpu.core_type<tc>} {
    %0 = tpu.iota {dimensions = array<i32: 1>} : vector<1x128xi32>
    %c32_i32 = arith.constant 32 : i32
    %1 = vector.broadcast %c32_i32 : i32 to vector<1x128xi32>
    %2 = arith.cmpi slt, %0, %1 : vector<1x128xi32>
    %3 = arith.extui %2 : vector<1x128xi1> to vector<1x128xi32>
    %4 = arith.sitofp %3 : vector<1x128xi32> to vector<1x128xf32>
    %c0 = arith.constant 0 : index
    %c0_0 = arith.constant 0 : index
    %5 = vector.load %arg0[%c0, %c0_0] : memref<16x16xbf16, #tpu.memory_space<vmem>>, vector<16x16xbf16>
    %c0_1 = arith.constant 0 : index
    %c0_2 = arith.constant 0 : index
    %6 = vector.load %arg1[%c0_1, %c0_2] : memref<16x128xf32, #tpu.memory_space<vmem>>, vector<16x128xf32>
    %c0_3 = arith.constant 0 : index
    %c0_4 = arith.constant 0 : index
    %7 = vector.load %arg2[%c0_3, %c0_4] : memref<128x128xf32, #tpu.memory_space<vmem>>, vector<128x128xf32>
    %cst = arith.constant dense<0.000000e+00> : vector<16x128xf32>
    %8 = tpu.matmul %6, %7, %cst {dimension_numbers = #tpu.dot_dimension_numbers<[1], [0], [0], [1], [0, 0, 1, 1], [], []>} : vector<16x128xf32>, vector<128x128xf32>, vector<16x128xf32> -> vector<16x128xf32>
    %9 = arith.truncf %8 : vector<16x128xf32> to vector<16x128xbf16>
    %cst_5 = arith.constant dense<0.000000e+00> : vector<16x128xf32>
    %10 = tpu.matmul %5, %9, %cst_5 {dimension_numbers = #tpu.dot_dimension_numbers<[1], [0], [0], [1], [0, 0, 1, 1], [], []>} : vector<16x16xbf16>, vector<16x128xbf16>, vector<16x128xf32> -> vector<16x128xf32>
    %c0_6 = arith.constant 0 : index
    %c0_7 = arith.constant 0 : index
    %11 = vector.load %arg3[%c0_6, %c0_7] : memref<1x128xf32, #tpu.memory_space<vmem>>, vector<1x128xf32>
    %12 = vector.broadcast %11 : vector<1x128xf32> to vector<16x128xf32>
    %13 = arith.addf %10, %12 : vector<16x128xf32>
    %cst_8 = arith.constant 0.000000e+00 : f32
    %14 = vector.broadcast %cst_8 : f32 to vector<16x128xf32>
    %15 = arith.maximumf %13, %14 : vector<16x128xf32>
    %c0_9 = arith.constant 0 : index
    %c0_10 = arith.constant 0 : index
    %16 = vector.load %arg21[%c0_9, %c0_10] : memref<16x128xf32, #tpu.memory_space<vmem>>, vector<16x128xf32>
    tpu.vector_store %arg21[%c0_9, %c0_10], %15 {strides = array<i32>} : memref<16x128xf32, #tpu.memory_space<vmem>>, vector<16x128xf32>,
    %cst_11 = arith.constant dense<0.000000e+00> : vector<16xf32>
    %17 = vector.multi_reduction <add>, %15, %cst_11 [1] : vector<16x128xf32> to vector<16xf32>
    %18 = vector.shape_cast %17 : vector<16xf32> to vector<16x1xf32>
    %cst_12 = arith.constant 3.125000e-02 : f32
    %19 = vector.broadcast %cst_12 : f32 to vector<16x1xf32>
    %20 = arith.mulf %18, %19 : vector<16x1xf32>
    %21 = vector.broadcast %20 : vector<16x1xf32> to vector<16x128xf32>
    %22 = arith.subf %15, %21 : vector<16x128xf32>
    %23 = vector.broadcast %4 : vector<1x128xf32> to vector<16x128xf32>
    %24 = arith.mulf %22, %23 : vector<16x128xf32>
    %25 = arith.mulf %24, %24 : vector<16x128xf32>
    %cst_13 = arith.constant dense<0.000000e+00> : vector<16xf32>
    %26 = vector.multi_reduction <add>, %25, %cst_13 [1] : vector<16x128xf32> to vector<16xf32>
    %27 = vector.shape_cast %26 : vector<16xf32> to vector<16x1xf32>
    %cst_14 = arith.constant 3.125000e-02 : f32
    %28 = vector.broadcast %cst_14 : f32 to vector<16x1xf32>
    %29 = arith.mulf %27, %28 : vector<16x1xf32>
    %cst_15 = arith.constant 9.99999974E-6 : f32
    %30 = vector.broadcast %cst_15 : f32 to vector<16x1xf32>
    %31 = arith.addf %29, %30 : vector<16x1xf32>
    %32 = math.rsqrt %31 : vector<16x1xf32>
    %33 = vector.broadcast %32 : vector<16x1xf32> to vector<16x128xf32>
    %34 = arith.mulf %24, %33 : vector<16x128xf32>
    %c0_16 = arith.constant 0 : index
    %c0_17 = arith.constant 0 : index
    %35 = vector.load %arg4[%c0_16, %c0_17] : memref<1x128xf32, #tpu.memory_space<vmem>>, vector<1x128xf32>
    %36 = vector.broadcast %35 : vector<1x128xf32> to vector<16x128xf32>
    %37 = arith.mulf %34, %36 : vector<16x128xf32>
    %c0_18 = arith.constant 0 : index
    %c0_19 = arith.constant 0 : index
    %38 = vector.load %arg5[%c0_18, %c0_19] : memref<1x128xf32, #tpu.memory_space<vmem>>, vector<1x128xf32>
    %39 = vector.broadcast %38 : vector<1x128xf32> to vector<16x128xf32>
    %40 = arith.addf %37, %39 : vector<16x128xf32>
    %c0_20 = arith.constant 0 : index
    %c0_21 = arith.constant 0 : index
    %41 = vector.load %arg6[%c0_20, %c0_21] : memref<128x128xf32, #tpu.memory_space<vmem>>, vector<128x128xf32>
    %cst_22 = arith.constant dense<0.000000e+00> : vector<16x128xf32>
    %42 = tpu.matmul %40, %41, %cst_22 {dimension_numbers = #tpu.dot_dimension_numbers<[1], [0], [0], [1], [0, 0, 1, 1], [], []>} : vector<16x128xf32>, vector<128x128xf32>, vector<16x128xf32> -> vector<16x128xf32>
    %43 = arith.truncf %42 : vector<16x128xf32> to vector<16x128xbf16>
    %cst_23 = arith.constant dense<0.000000e+00> : vector<16x128xf32>
    %44 = tpu.matmul %5, %43, %cst_23 {dimension_numbers = #tpu.dot_dimension_numbers<[1], [0], [0], [1], [0, 0, 1, 1], [], []>} : vector<16x16xbf16>, vector<16x128xbf16>, vector<16x128xf32> -> vector<16x128xf32>
    %c0_24 = arith.constant 0 : index
    %c0_25 = arith.constant 0 : index
    %45 = vector.load %arg7[%c0_24, %c0_25] : memref<1x128xf32, #tpu.memory_space<vmem>>, vector<1x128xf32>
    %46 = vector.broadcast %45 : vector<1x128xf32> to vector<16x128xf32>
    %47 = arith.addf %44, %46 : vector<16x128xf32>
    %cst_26 = arith.constant 0.000000e+00 : f32
    %48 = vector.broadcast %cst_26 : f32 to vector<16x128xf32>
    %49 = arith.maximumf %47, %48 : vector<16x128xf32>
    %c0_27 = arith.constant 0 : index
    %c0_28 = arith.constant 0 : index
    %50 = vector.load %arg22[%c0_27, %c0_28] : memref<16x128xf32, #tpu.memory_space<vmem>>, vector<16x128xf32>
    tpu.vector_store %arg22[%c0_27, %c0_28], %49 {strides = array<i32>} : memref<16x128xf32, #tpu.memory_space<vmem>>, vector<16x128xf32>,
    %cst_29 = arith.constant dense<0.000000e+00> : vector<16xf32>
    %51 = vector.multi_reduction <add>, %49, %cst_29 [1] : vector<16x128xf32> to vector<16xf32>
    %52 = vector.shape_cast %51 : vector<16xf32> to vector<16x1xf32>
    %cst_30 = arith.constant 3.125000e-02 : f32
    %53 = vector.broadcast %cst_30 : f32 to vector<16x1xf32>
    %54 = arith.mulf %52, %53 : vector<16x1xf32>
    %55 = vector.broadcast %54 : vector<16x1xf32> to vector<16x128xf32>
    %56 = arith.subf %49, %55 : vector<16x128xf32>
    %57 = vector.broadcast %4 : vector<1x128xf32> to vector<16x128xf32>
    %58 = arith.mulf %56, %57 : vector<16x128xf32>
    %59 = arith.mulf %58, %58 : vector<16x128xf32>
    %cst_31 = arith.constant dense<0.000000e+00> : vector<16xf32>
    %60 = vector.multi_reduction <add>, %59, %cst_31 [1] : vector<16x128xf32> to vector<16xf32>
    %61 = vector.shape_cast %60 : vector<16xf32> to vector<16x1xf32>
    %cst_32 = arith.constant 3.125000e-02 : f32
    %62 = vector.broadcast %cst_32 : f32 to vector<16x1xf32>
    %63 = arith.mulf %61, %62 : vector<16x1xf32>
    %cst_33 = arith.constant 9.99999974E-6 : f32
    %64 = vector.broadcast %cst_33 : f32 to vector<16x1xf32>
    %65 = arith.addf %63, %64 : vector<16x1xf32>
    %66 = math.rsqrt %65 : vector<16x1xf32>
    %67 = vector.broadcast %66 : vector<16x1xf32> to vector<16x128xf32>
    %68 = arith.mulf %58, %67 : vector<16x128xf32>
    %c0_34 = arith.constant 0 : index
    %c0_35 = arith.constant 0 : index
    %69 = vector.load %arg8[%c0_34, %c0_35] : memref<1x128xf32, #tpu.memory_space<vmem>>, vector<1x128xf32>
    %70 = vector.broadcast %69 : vector<1x128xf32> to vector<16x128xf32>
    %71 = arith.mulf %68, %70 : vector<16x128xf32>
    %c0_36 = arith.constant 0 : index
    %c0_37 = arith.constant 0 : index
    %72 = vector.load %arg9[%c0_36, %c0_37] : memref<1x128xf32, #tpu.memory_space<vmem>>, vector<1x128xf32>
    %73 = vector.broadcast %72 : vector<1x128xf32> to vector<16x128xf32>
    %74 = arith.addf %71, %73 : vector<16x128xf32>
    %c0_38 = arith.constant 0 : index
    %c0_39 = arith.constant 0 : index
    %75 = vector.load %arg10[%c0_38, %c0_39] : memref<128x128xf32, #tpu.memory_space<vmem>>, vector<128x128xf32>
    %cst_40 = arith.constant dense<0.000000e+00> : vector<16x128xf32>
    %76 = tpu.matmul %74, %75, %cst_40 {dimension_numbers = #tpu.dot_dimension_numbers<[1], [0], [0], [1], [0, 0, 1, 1], [], []>} : vector<16x128xf32>, vector<128x128xf32>, vector<16x128xf32> -> vector<16x128xf32>
    %77 = arith.truncf %76 : vector<16x128xf32> to vector<16x128xbf16>
    %cst_41 = arith.constant dense<0.000000e+00> : vector<16x128xf32>
    %78 = tpu.matmul %5, %77, %cst_41 {dimension_numbers = #tpu.dot_dimension_numbers<[1], [0], [0], [1], [0, 0, 1, 1], [], []>} : vector<16x16xbf16>, vector<16x128xbf16>, vector<16x128xf32> -> vector<16x128xf32>
    %c0_42 = arith.constant 0 : index
    %c0_43 = arith.constant 0 : index
    %79 = vector.load %arg11[%c0_42, %c0_43] : memref<1x128xf32, #tpu.memory_space<vmem>>, vector<1x128xf32>
    %80 = vector.broadcast %79 : vector<1x128xf32> to vector<16x128xf32>
    %81 = arith.addf %78, %80 : vector<16x128xf32>
    %cst_44 = arith.constant 0.000000e+00 : f32
    %82 = vector.broadcast %cst_44 : f32 to vector<16x128xf32>
    %83 = arith.maximumf %81, %82 : vector<16x128xf32>
    %c0_45 = arith.constant 0 : index
    %c0_46 = arith.constant 0 : index
    %84 = vector.load %arg23[%c0_45, %c0_46] : memref<16x128xf32, #tpu.memory_space<vmem>>, vector<16x128xf32>
    tpu.vector_store %arg23[%c0_45, %c0_46], %83 {strides = array<i32>} : memref<16x128xf32, #tpu.memory_space<vmem>>, vector<16x128xf32>,
    %c0_47 = arith.constant 0 : index
    %c0_48 = arith.constant 0 : index
    %85 = vector.load %arg20[%c0_47, %c0_48] : memref<16x128xf32, #tpu.memory_space<vmem>>, vector<16x128xf32>
    tpu.vector_store %arg20[%c0_47, %c0_48], %81 {strides = array<i32>} : memref<16x128xf32, #tpu.memory_space<vmem>>, vector<16x128xf32>,
    %cst_49 = arith.constant dense<0.000000e+00> : vector<16xf32>
    %86 = vector.multi_reduction <add>, %83, %cst_49 [1] : vector<16x128xf32> to vector<16xf32>
    %87 = vector.shape_cast %86 : vector<16xf32> to vector<16x1xf32>
    %cst_50 = arith.constant 3.125000e-02 : f32
    %88 = vector.broadcast %cst_50 : f32 to vector<16x1xf32>
    %89 = arith.mulf %87, %88 : vector<16x1xf32>
    %90 = vector.broadcast %89 : vector<16x1xf32> to vector<16x128xf32>
    %91 = arith.subf %83, %90 : vector<16x128xf32>
    %92 = vector.broadcast %4 : vector<1x128xf32> to vector<16x128xf32>
    %93 = arith.mulf %91, %92 : vector<16x128xf32>
    %94 = arith.mulf %93, %93 : vector<16x128xf32>
    %cst_51 = arith.constant dense<0.000000e+00> : vector<16xf32>
    %95 = vector.multi_reduction <add>, %94, %cst_51 [1] : vector<16x128xf32> to vector<16xf32>
    %96 = vector.shape_cast %95 : vector<16xf32> to vector<16x1xf32>
    %cst_52 = arith.constant 3.125000e-02 : f32
    %97 = vector.broadcast %cst_52 : f32 to vector<16x1xf32>
    %98 = arith.mulf %96, %97 : vector<16x1xf32>
    %cst_53 = arith.constant 9.99999974E-6 : f32
    %99 = vector.broadcast %cst_53 : f32 to vector<16x1xf32>
    %100 = arith.addf %98, %99 : vector<16x1xf32>
    %101 = math.rsqrt %100 : vector<16x1xf32>
    %102 = vector.broadcast %101 : vector<16x1xf32> to vector<16x128xf32>
    %103 = arith.mulf %93, %102 : vector<16x128xf32>
    %c0_54 = arith.constant 0 : index
    %c0_55 = arith.constant 0 : index
    %104 = vector.load %arg12[%c0_54, %c0_55] : memref<1x128xf32, #tpu.memory_space<vmem>>, vector<1x128xf32>
    %105 = vector.broadcast %104 : vector<1x128xf32> to vector<16x128xf32>
    %106 = arith.mulf %103, %105 : vector<16x128xf32>
    %c0_56 = arith.constant 0 : index
    %c0_57 = arith.constant 0 : index
    %107 = vector.load %arg13[%c0_56, %c0_57] : memref<1x128xf32, #tpu.memory_space<vmem>>, vector<1x128xf32>
    %108 = vector.broadcast %107 : vector<1x128xf32> to vector<16x128xf32>
    %109 = arith.addf %106, %108 : vector<16x128xf32>
    %c0_58 = arith.constant 0 : index
    %c0_59 = arith.constant 0 : index
    %110 = vector.load %arg14[%c0_58, %c0_59] : memref<128x128xf32, #tpu.memory_space<vmem>>, vector<128x128xf32>
    %cst_60 = arith.constant dense<0.000000e+00> : vector<16x128xf32>
    %111 = tpu.matmul %109, %110, %cst_60 {dimension_numbers = #tpu.dot_dimension_numbers<[1], [0], [0], [1], [0, 0, 1, 1], [], []>} : vector<16x128xf32>, vector<128x128xf32>, vector<16x128xf32> -> vector<16x128xf32>
    %c0_61 = arith.constant 0 : index
    %c0_62 = arith.constant 0 : index
    %112 = vector.load %arg15[%c0_61, %c0_62] : memref<1x128xf32, #tpu.memory_space<vmem>>, vector<1x128xf32>
    %113 = vector.broadcast %112 : vector<1x128xf32> to vector<16x128xf32>
    %114 = arith.addf %111, %113 : vector<16x128xf32>
    %c0_63 = arith.constant 0 : index
    %c0_64 = arith.constant 0 : index
    %115 = vector.load %arg16[%c0_63, %c0_64] : memref<128x128xf32, #tpu.memory_space<vmem>>, vector<128x128xf32>
    %cst_65 = arith.constant dense<0.000000e+00> : vector<16x128xf32>
    %116 = tpu.matmul %114, %115, %cst_65 {dimension_numbers = #tpu.dot_dimension_numbers<[1], [0], [0], [1], [0, 0, 1, 1], [], []>} : vector<16x128xf32>, vector<128x128xf32>, vector<16x128xf32> -> vector<16x128xf32>
    %c0_66 = arith.constant 0 : index
    %c0_67 = arith.constant 0 : index
    %117 = vector.load %arg17[%c0_66, %c0_67] : memref<1x128xf32, #tpu.memory_space<vmem>>, vector<1x128xf32>
    %118 = vector.broadcast %117 : vector<1x128xf32> to vector<16x128xf32>
    %119 = arith.addf %116, %118 : vector<16x128xf32>
    %c0_68 = arith.constant 0 : index
    %c0_69 = arith.constant 0 : index
    %120 = vector.load %arg18[%c0_68, %c0_69] : memref<128x128xf32, #tpu.memory_space<vmem>>, vector<128x128xf32>
    %cst_70 = arith.constant dense<0.000000e+00> : vector<16x128xf32>
    %121 = tpu.matmul %119, %120, %cst_70 {dimension_numbers = #tpu.dot_dimension_numbers<[1], [0], [0], [1], [0, 0, 1, 1], [], []>} : vector<16x128xf32>, vector<128x128xf32>, vector<16x128xf32> -> vector<16x128xf32>
    %c0_71 = arith.constant 0 : index
    %c0_72 = arith.constant 0 : index
    %122 = vector.load %arg19[%c0_71, %c0_72] : memref<1x128xf32, #tpu.memory_space<vmem>>, vector<1x128xf32>
    %123 = vector.broadcast %122 : vector<1x128xf32> to vector<16x128xf32>
    %124 = arith.addf %121, %123 : vector<16x128xf32>
    %125 = tpu.iota {dimensions = array<i32: 1>} : vector<1x128xi32>
    %c8_i32 = arith.constant 8 : i32
    %126 = vector.broadcast %c8_i32 : i32 to vector<1x128xi32>
    %127 = arith.cmpi slt, %125, %126 : vector<1x128xi32>
    %cst_73 = arith.constant -1.000000e+30 : f32
    %128 = vector.shape_cast %127 : vector<1x128xi1> to vector<1x128xi1>
    %129 = vector.broadcast %128 : vector<1x128xi1> to vector<16x128xi1>
    %130 = vector.broadcast %cst_73 : f32 to vector<16x128xf32>
    %131 = arith.select %129, %124, %130 : vector<16x128xi1>, vector<16x128xf32>
    %cst_74 = arith.constant dense<0xFF800000> : vector<16xf32>
    %132 = vector.multi_reduction <maximumf>, %131, %cst_74 [1] : vector<16x128xf32> to vector<16xf32>
    %133 = vector.shape_cast %132 : vector<16xf32> to vector<16x1xf32>
    %134 = vector.broadcast %133 : vector<16x1xf32> to vector<16x128xf32>
    %135 = arith.subf %131, %134 : vector<16x128xf32>
    %136 = math.exp %135 : vector<16x128xf32>
    %cst_75 = arith.constant dense<0.000000e+00> : vector<16xf32>
    %137 = vector.multi_reduction <add>, %136, %cst_75 [1] : vector<16x128xf32> to vector<16xf32>
    %138 = vector.shape_cast %137 : vector<16xf32> to vector<16x1xf32>
    %139 = math.log %138 : vector<16x1xf32>
    %140 = vector.broadcast %139 : vector<16x1xf32> to vector<16x128xf32>
    %141 = arith.subf %135, %140 : vector<16x128xf32>
    %c0_76 = arith.constant 0 : index
    %c0_77 = arith.constant 0 : index
    %142 = vector.load %arg24[%c0_76, %c0_77] : memref<16x128xf32, #tpu.memory_space<vmem>>, vector<16x128xf32>
    tpu.vector_store %arg24[%c0_76, %c0_77], %141 {strides = array<i32>} : memref<16x128xf32, #tpu.memory_space<vmem>>, vector<16x128xf32>,
    return
  }
}

</mosaic_0001>

<bundles_post_ra>
// kernel: tpu_custom_call.1
= control target key start
LH: loop header
LB: loop body
LE: loop exit
PB: predicated region body
PF: predicated region fallthrough
CT: control target
= control target key end

     0   :  { %s2143_s0 = inlined_call_operand.hbm [shape: bf16[16,16], index: 0, kind: input, shape index: {}]   ;;  %s2144_s1 = inlined_call_operand.hbm [shape: f32[16,128], index: 1, kind: input, shape index: {}]   ;;  %s2145_s2 = inlined_call_operand.hbm [shape: f32[128,128], index: 2, kind: input, shape index: {}]   ;;  %s2146_s3 = inlined_call_operand.vmem [shape: f32[1,128], index: 3, kind: input, shape index: {}]   ;;  %s2147_s4 = inlined_call_operand.vmem [shape: f32[1,128], index: 4, kind: input, shape index: {}]   ;;  %s2148_s5 = inlined_call_operand.vmem [shape: f32[1,128], index: 5, kind: input, shape index: {}]   ;;  %s2149_s6 = inlined_call_operand.hbm [shape: f32[128,128], index: 6, kind: input, shape index: {}]   ;;  %s2150_s7 = inlined_call_operand.vmem [shape: f32[1,128], index: 7, kind: input, shape index: {}]   ;;  %s2151_s8 = inlined_call_operand.vmem [shape: f32[1,128], index: 8, kind: input, shape index: {}]   ;;  %s2152_s9 = inlined_call_operand.vmem [shape: f32[1,128], index: 9, kind: input, shape index: {}]   ;;  %s2153_s10 = inlined_call_operand.hbm [shape: f32[128,128], index: 10, kind: input, shape index: {}]   ;;  %s2154_s11 = inlined_call_operand.vmem [shape: f32[1,128], index: 11, kind: input, shape index: {}]   ;;  %s2155_s12 = inlined_call_operand.vmem [shape: f32[1,128], index: 12, kind: input, shape index: {}]   ;;  %s2156_s13 = inlined_call_operand.vmem [shape: f32[1,128], index: 13, kind: input, shape index: {}]   ;;  %s2157_s14 = inlined_call_operand.hbm [shape: f32[128,128], index: 14, kind: input, shape index: {}]   ;;  %s2158_s15 = inlined_call_operand.vmem [shape: f32[1,128], index: 15, kind: input, shape index: {}]   ;;  %s2159_s16 = inlined_call_operand.hbm [shape: f32[128,128], index: 16, kind: input, shape index: {}]   ;;  %s2160_s17 = inlined_call_operand.vmem [shape: f32[1,128], index: 17, kind: input, shape index: {}]   ;;  %s2161_s18 = inlined_call_operand.hbm [shape: f32[128,128], index: 18, kind: input, shape index: {}]   ;;  %s2162_s19 = inlined_call_operand.vmem [shape: f32[1,128], index: 19, kind: input, shape index: {}]   ;;  %s2163_s20 = inlined_call_operand.hbm [shape: f32[16,128], index: 20, kind: output, shape index: {0}]   ;;  %s2164_s21 = inlined_call_operand.hbm [shape: f32[16,128], index: 21, kind: output, shape index: {1}]   ;;  %s2165_s22 = inlined_call_operand.hbm [shape: f32[16,128], index: 22, kind: output, shape index: {2}]   ;;  %s2166_s23 = inlined_call_operand.hbm [shape: f32[16,128], index: 23, kind: output, shape index: {3}]   ;;  %s2167_s24 = inlined_call_operand.hbm [shape: f32[16,128], index: 24, kind: output, shape index: {4}]  }
   0x1   :  { %2168 = sst [smem:[#allocation31_spill]] %s2143_s0 }
   0x2   :  { %2169 = sst [smem:[#allocation32_spill]] %s2144_s1 }
   0x3   :  { %2170 = sst [smem:[#allocation33_spill]] %s2145_s2 }
   0x4   :  { %2171 = sst [smem:[#allocation34_spill]] %s2146_s3 }
   0x5   :  { %2172 = sst [smem:[#allocation35_spill]] %s2147_s4 }
   0x6   :  { %2173 = sst [smem:[#allocation36_spill]] %s2148_s5 }
   0x7   :  { %2174 = sst [smem:[#allocation37_spill]] %s2149_s6 }
   0x8   :  { %2175 = sst [smem:[#allocation38_spill]] %s2150_s7 }
   0x9   :  { %2176 = sst [smem:[#allocation39_spill]] %s2151_s8 }
   0xa   :  { %30 = vsyncpa [#allocation3], 0 }
   0xb   :  { %31 = vsyncpa [#allocation6], 0 }
   0xc   :  { %32 = vsyncpa [#allocation9], 0 }
   0xd   :  { %33 = vsyncpa [#allocation12], 0 }
   0xe   :  { %34 = vsyncpa [#allocation15], 0 }
   0xf   :  { %35 = vsyncpa [#allocation4], 0 }
  0x10   :  { %36 = vsyncpa [#allocation18], 0 }
  0x11   :  { %37 = vsyncpa [#allocation21], 0  ;;  %s1840_s5 = smov [#allocation5]  }
  0x12   :  { %s55_s26 = sshll.u32 %s1840_s5, 4  ;;  %s56_s26 = int_to_ptr.vmem [resolvable:$true] %s55_s26 }
  0x13   :  { %s1572_s27 = scalar_lea.vmem %s56_s26, 256  ;;  %p1577_p1 = scmp.lt.s32.totalorder %s56_s26, %s56_s26 }
  0x14   :  { %p1573_p0 = scmp.ne.s32.totalorder %s56_s26, %s1572_s27  ;;  %p1578_p2 = scmp.lt.s32.totalorder %s1572_s27, %s1572_s27 }
  0x16   :  { %p1579_p3 = por %p1578_p2, %p1577_p1 }
  0x18   :  { %p1580_p4 = pnand %p1579_p3, %p1573_p0 }
  0x1a   :  { %1583 = shalt.err (!%p1580_p4)
}
  0x1b   :  { %s1841_s28 = smov 128   ;;  %s1842_s6 = smov 8  }
  0x1c   :  { %s2177_s0 = sld [smem:[#allocation32_spill]]  ;;  %s1843_s7 = smov [#allocation8]  }
  0x1d   :  { %s85_s30 = sshll.u32 %s1843_s7, 4  ;;  %s1844_s3 = smov [#allocation11]   ;;  %s86_s30 = int_to_ptr.vmem [resolvable:$true] %s85_s30 }
  0x1e   :  { %s121_s25 = sshll.u32 %s1844_s3, 4  ;;  %s1592_s8 = scalar_lea.vmem %s86_s30, 2048  ;;  %s122_s25 = int_to_ptr.vmem [resolvable:$true] %s121_s25 }
  0x1f   :  { %p1593_p5 = scmp.ne.s32.totalorder %s86_s30, %s1592_s8  ;;  %p1597_p6 = scmp.lt.s32.totalorder %s86_s30, %s86_s30 }
  0x20   :  { %p1598_p7 = scmp.lt.s32.totalorder %s1592_s8, %s1592_s8 }
  0x22   :  { %61 = dma.hbm_to_vmem [thread:$0]  %s2177_s0, 256, %s56_s26, [#allocation6], %s1841_s28, %s1841_s28, %s1842_s6  }
  0x23   :  { %p1599_p8 = por %p1598_p7, %p1597_p6 }
  0x25   :  { %p1600_p9 = pnand %p1599_p8, %p1593_p5 }
  0x27   :  { %1603 = shalt.err (!%p1600_p9)
}
  0x28   :  { %s2178_s5 = sld [smem:[#allocation37_spill]]  ;;  %s1612_s26 = scalar_lea.vmem %s122_s25, 2048 }
  0x29   :  { %p1613_p10 = scmp.ne.s32.totalorder %s122_s25, %s1612_s26  ;;  %p1617_p11 = scmp.lt.s32.totalorder %s122_s25, %s122_s25 }
  0x2a   :  { %p1618_p12 = scmp.lt.s32.totalorder %s1612_s26, %s1612_s26 }
  0x2c   :  { %p1619_p13 = por %p1618_p12, %p1617_p11 }
  0x2e   :  { %91 = dma.hbm_to_vmem [thread:$0]  %s2178_s5, 2048, %s86_s30, [#allocation9], %s1841_s28, %s1841_s28, %s1842_s6  }
  0x2f   :  { %p1620_p0 = pnand %p1619_p13, %p1613_p10 }
  0x31   :  { %1623 = shalt.err (!%p1620_p0)
}
  0x32   :  { %127 = dma.hbm_to_vmem [thread:$0]  %s2157_s14, 2048, %s122_s25, [#allocation12], %s1841_s28, %s1841_s28, %s1842_s6  }
  0x33   :  { %s1845_s29 = smov [#allocation2]  }
  0x34   :  { %s43_s0 = sshll.u32 %s1845_s29, 4  ;;  %s44_s0 = int_to_ptr.vmem [resolvable:$true] %s43_s0 }
  0x35   :  { %s1632_s7 = scalar_lea.vmem %s44_s0, 128  ;;  %p1637_p2 = scmp.lt.s32.totalorder %s44_s0, %s44_s0 }
  0x36   :  { %p1633_p1 = scmp.ne.s32.totalorder %s44_s0, %s1632_s7  ;;  %p1638_p3 = scmp.lt.s32.totalorder %s1632_s7, %s1632_s7 }
  0x38   :  { %p1639_p4 = por %p1638_p3, %p1637_p2 }
  0x3a   :  { %p1640_p5 = pnand %p1639_p4, %p1633_p1 }
  0x3c   :  { %1643 = shalt.err (!%p1640_p5)
}
  0x3d   :  { %s1846_s30 = smov 64   ;;  %s1847_s3 = smov 4  }
  0x3e   :  { %s2179_s1 = sld [smem:[#allocation31_spill]]  ;;  %s1848_s5 = smov [#allocation7]  }
  0x3f   :  { %s67_s26 = sshll.u32 %s1848_s5, 4  ;;  %s1849_s27 = smov [#allocation10]   ;;  %s68_s26 = int_to_ptr.vmem [resolvable:$true] %s67_s26 }
  0x40   :  { %s103_s14 = sshll.u32 %s1849_s27, 4  ;;  %s1652_s25 = scalar_lea.vmem %s68_s26, 2048  ;;  %s104_s14 = int_to_ptr.vmem [resolvable:$true] %s103_s14 }
  0x41   :  { %p1653_p6 = scmp.ne.s32.totalorder %s68_s26, %s1652_s25  ;;  %p1657_p7 = scmp.lt.s32.totalorder %s68_s26, %s68_s26 }
  0x42   :  { %p1658_p8 = scmp.lt.s32.totalorder %s1652_s25, %s1652_s25 }
  0x44   :  { %49 = dma.hbm_to_vmem [thread:$0]  %s2179_s1, 128, %s44_s0, [#allocation3], %s1846_s30, %s1846_s30, %s1847_s3  }
  0x45   :  { %p1659_p9 = por %p1658_p8, %p1657_p7 }
  0x47   :  { %p1660_p10 = pnand %p1659_p9, %p1653_p6 }
  0x49   :  { %1663 = shalt.err (!%p1660_p10)
}
  0x4a   :  { %s2180_s7 = sld [smem:[#allocation33_spill]]  ;;  %s1672_s0 = scalar_lea.vmem %s104_s14, 2048 }
  0x4b   :  { %p1673_p11 = scmp.ne.s32.totalorder %s104_s14, %s1672_s0  ;;  %p1677_p12 = scmp.lt.s32.totalorder %s104_s14, %s104_s14 }
  0x4c   :  { %p1678_p13 = scmp.lt.s32.totalorder %s1672_s0, %s1672_s0 }
  0x4e   :  { %p1679_p0 = por %p1678_p13, %p1677_p12 }
  0x50   :  { %73 = dma.hbm_to_vmem [thread:$0]  %s2180_s7, 2048, %s68_s26, [#allocation6], %s1841_s28, %s1841_s28, %s1842_s6  }
  0x51   :  { %p1680_p1 = pnand %p1679_p0, %p1673_p11 }
  0x53   :  { %1683 = shalt.err (!%p1680_p1)
}
  0x54   :  { %109 = dma.hbm_to_vmem [thread:$0]  %s2153_s10, 2048, %s104_s14, [#allocation9], %s1841_s28, %s1841_s28, %s1842_s6  }
  0x55   :  { %s1850_s8 = smov [#allocation13]   ;;  %s1851_s1 = smov [#allocation14]  }
  0x56   :  { %s135_s4 = sshll.u32 %s1850_s8, 4  ;;  %s149_s5 = sshll.u32 %s1851_s1, 4  ;;  %s136_s4 = int_to_ptr.vmem [resolvable:$true] %s135_s4  ;;  %s150_s5 = int_to_ptr.vmem [resolvable:$true] %s149_s5 }
  0x57   :  { %s1692_s26 = scalar_lea.vmem %s136_s4, 2048  ;;  %p1697_p3 = scmp.lt.s32.totalorder %s136_s4, %s136_s4 }
  0x58   :  { %p1693_p2 = scmp.ne.s32.totalorder %s136_s4, %s1692_s26  ;;  %p1698_p4 = scmp.lt.s32.totalorder %s1692_s26, %s1692_s26 }
  0x5a   :  { %p1699_p5 = por %p1698_p4, %p1697_p3 }
  0x5c   :  { %p1700_p6 = pnand %p1699_p5, %p1693_p2 }
  0x5e   :  { %1703 = shalt.err (!%p1700_p6)
}
  0x5f   :  { %141 = dma.hbm_to_vmem [thread:$0]  %s2159_s16, 2048, %s136_s4, [#allocation12], %s1841_s28, %s1841_s28, %s1842_s6  }
  0x60   :  { %s1712_s10 = scalar_lea.vmem %s150_s5, 2048  ;;  %p1717_p8 = scmp.lt.s32.totalorder %s150_s5, %s150_s5 }
  0x61   :  { %p1713_p7 = scmp.ne.s32.totalorder %s150_s5, %s1712_s10  ;;  %p1718_p9 = scmp.lt.s32.totalorder %s1712_s10, %s1712_s10 }
  0x63   :  { %p1719_p10 = por %p1718_p9, %p1717_p8 }
  0x65   :  { %p1720_p11 = pnand %p1719_p10, %p1713_p7 }
  0x67   :  { %1723 = shalt.err (!%p1720_p11)
}
  0x68   :  { %155 = dma.hbm_to_vmem [thread:$0]  %s2161_s18, 2048, %s150_s5, [#allocation15], %s1841_s28, %s1841_s28, %s1842_s6  }
  0x69   :  { %1824 = dma.done.wait [#allocation3], 128  }
  0x6a   :  { %1825 = vsyncadd [#allocation3], 4294967168 }
  0x6b   :  { %1826 = dma.done.wait [#allocation6], 2304  }
  0x6c   :  { %1827 = vsyncadd [#allocation6], 4294964992 }
  0x6d   :  { %1828 = dma.done.wait [#allocation9], 4096  }
  0x6e   :  { %1829 = vsyncadd [#allocation9], 4294963200 }
  0x6f   :  { %1830 = dma.done.wait [#allocation12], 4096  }
  0x70   :  { %1831 = vsyncadd [#allocation12], 4294963200 }
  0x71   :  { %1832 = dma.done.wait [#allocation15], 2048  }
  0x72   :  { %1833 = vsyncadd [#allocation15], 4294965248  ;;  %v207_v0 = vld [vmem:[#allocation7 + $0x78] sm:$0xff]  ;;  %v206_v1 = vld [vmem:[#allocation7 + $0x70] sm:$0xff]  ;;  %v1852_v18 = vmov 0.0   ;;  %vm1853_vm0 = vmmov 0   ;;  %v183_v34 = vlaneseq }
  0x73   :  { %1296 = vmatprep.subr.mxu0 %v207_v0  ;;  %v205_v2 = vld [vmem:[#allocation7 + $0x68] sm:$0xff]  ;;  %v204_v3 = vld [vmem:[#allocation7 + $0x60] sm:$0xff]  ;;  %v190_v4 = vld [vmem:[#allocation5] sm:$0xff]  ;;  %1331 = vmatprep.subr.bf16.mxu1 %v1852_v18  ;;  %vm296_vm1 = vcmask 130048   ;;  %s2181_s29 = sld [smem:[#allocation34_spill]]  ;;  %s1855_s8 = smov [#allocation20]  }
  0x74   :  { %1297 = vmatpush3.msra.mxu0 %v207_v0  ;;  %v203_v5 = vld [vmem:[#allocation7 + $0x58] sm:$0xff]  ;;  %1328 = vmatprep.mubr.f32.mxu0 %v190_v4  ;;  %v202_v6 = vld [vmem:[#allocation7 + $0x50] sm:$0xff]  ;;  %v201_v7 = vld [vmem:[#allocation7 + $0x48] sm:$0xff]  ;;  %v2042_v35 = vand.u32 127, %v183_v34  ;;  %s2182_s30 = sld [smem:[#allocation35_spill]] }
  0x75   :  { %1298 = vmatprep.subr.mxu0 %v206_v1  ;;  %v200_v8 = vld [vmem:[#allocation7 + $0x40] sm:$0xff]  ;;  %v199_v9 = vld [vmem:[#allocation7 + $0x38] sm:$0xff]  ;;  %v198_v10 = vld [vmem:[#allocation7 + $0x30] sm:$0xff]  ;;  %1333 = vmatprep.mubr.msk.bf16.mxu1 %vm1853_vm0, %v1852_v18  ;;  %s2183_s4 = sld [smem:[#allocation36_spill]] }
  0x76   :  { %1299 = vmatpush3.msra.mxu0 %v206_v1  ;;  %v197_v11 = vld [vmem:[#allocation7 + $0x28] sm:$0xff]  ;;  %v196_v12 = vld [vmem:[#allocation7 + $0x20] sm:$0xff]  ;;  %v195_v13 = vld [vmem:[#allocation7 + $0x18] sm:$0xff]  ;;  %vm185_vm2 = vcmp.lt.s32.totalorder %v2042_v35, 32  ;;  %s2184_s26 = sld [smem:[#allocation38_spill]]  ;;  %vm1055_vm3 = vcmp.lt.s32.totalorder %v2042_v35, 8 }
  0x77   :  { %1300 = vmatprep.subr.mxu0 %v205_v2  ;;  %v194_v14 = vld [vmem:[#allocation7 + $0x10] sm:$0xff]  ;;  %v193_v15 = vld [vmem:[#allocation7 + $0x8] sm:$0xff]  ;;  %v192_v16 = vld [vmem:[#allocation7] sm:$0xff]  ;;  %v2046_v38 = vsel %vm185_vm2, 1.0, %v1852_v18  ;;  %s2185_s10 = sld [smem:[#allocation39_spill]] }
  0x78   :  { %1301 = vmatpush3.msra.mxu0 %v205_v2  ;;  %v191_v17 = vld [vmem:[#allocation5 + $0x8] sm:$0xff]  ;;  %v2035_v22 = vld [vmem:[#allocation2] sm:$0xff]   ;;  %v401_v33 = vld [vmem:[#allocation8 + $0x70] sm:$0xff] }
  0x79   :  { %1302 = vmatprep.subr.mxu0 %v204_v3  ;;  %v1166_v23 = vld [vmem:[%s2181_s29] ss:$0 sm:$0xff]  ;;  %v402_v32 = vld [vmem:[#allocation8 + $0x78] sm:$0xff]  ;;  %v399_v48 = vld [vmem:[#allocation8 + $0x60] sm:$0xff] }
  0x7a   :  { %1303 = vmatpush3.msra.mxu0 %v204_v3  ;;  %v400_v47 = vld [vmem:[#allocation8 + $0x68] sm:$0xff]  ;;  %v398_v49 = vld [vmem:[#allocation8 + $0x58] sm:$0xff]  ;;  %v397_v50 = vld [vmem:[#allocation8 + $0x50] sm:$0xff] }
  0x7b   :  { %1304 = vmatprep.subr.mxu0 %v203_v5  ;;  %v396_v51 = vld [vmem:[#allocation8 + $0x48] sm:$0xff]  ;;  %v395_v52 = vld [vmem:[#allocation8 + $0x40] sm:$0xff]  ;;  %v394_v53 = vld [vmem:[#allocation8 + $0x38] sm:$0xff] }
  0x7c   :  { %1305 = vmatpush3.msra.mxu0 %v203_v5  ;;  %v393_v54 = vld [vmem:[#allocation8 + $0x30] sm:$0xff]  ;;  %v392_v55 = vld [vmem:[#allocation8 + $0x28] sm:$0xff]  ;;  %v391_v56 = vld [vmem:[#allocation8 + $0x20] sm:$0xff] }
  0x7d   :  { %1306 = vmatprep.subr.mxu0 %v202_v6  ;;  %v390_v57 = vld [vmem:[#allocation8 + $0x18] sm:$0xff]  ;;  %v389_v58 = vld [vmem:[#allocation8 + $0x10] sm:$0xff]  ;;  %v388_v59 = vld [vmem:[#allocation8 + $0x8] sm:$0xff] }
  0x7e   :  { %1307 = vmatpush3.msra.mxu0 %v202_v6  ;;  %v387_v60 = vld [vmem:[#allocation8] sm:$0xff]  ;;  %v1169_v4 = vld [vmem:[%s2182_s30] ss:$0 sm:$0xff] }
  0x7f   :  { %1308 = vmatprep.subr.mxu0 %v201_v7  ;;  %v1170_v6 = vld [vmem:[%s2183_s4] ss:$0 sm:$0xff]  ;;  %s1123_s4 = sshll.u32 %s1855_s8, 4  ;;  %s1124_s4 = int_to_ptr.vmem [resolvable:$true] %s1123_s4 }
  0x80   :  { %1309 = vmatpush3.msra.mxu0 %v201_v7 }
  0x81   :  { %1310 = vmatprep.subr.mxu0 %v200_v8 }
  0x82   :  { %1311 = vmatpush3.msra.mxu0 %v200_v8 }
  0x83   :  { %1312 = vmatprep.subr.mxu0 %v199_v9 }
  0x84   :  { %1313 = vmatpush3.msra.mxu0 %v199_v9 }
  0x85   :  { %1314 = vmatprep.subr.mxu0 %v198_v10 }
  0x86   :  { %1315 = vmatpush3.msra.mxu0 %v198_v10 }
  0x87   :  { %1316 = vmatprep.subr.mxu0 %v197_v11 }
  0x88   :  { %1317 = vmatpush3.msra.mxu0 %v197_v11 }
  0x89   :  { %1318 = vmatprep.subr.mxu0 %v196_v12 }
  0x8a   :  { %1319 = vmatpush3.msra.mxu0 %v196_v12 }
  0x8b   :  { %1320 = vmatprep.subr.mxu0 %v195_v13 }
  0x8c   :  { %1321 = vmatpush3.msra.mxu0 %v195_v13 }
  0x8d   :  { %1322 = vmatprep.subr.mxu0 %v194_v14 }
  0x8e   :  { %1323 = vmatpush3.msra.mxu0 %v194_v14 }
  0x8f   :  { %1324 = vmatprep.subr.mxu0 %v193_v15 }
  0x90   :  { %1325 = vmatpush3.msra.mxu0 %v193_v15 }
  0x91   :  { %1326 = vmatprep.subr.mxu0 %v192_v16 }
  0x92   :  { %1327 = vmatpush3.msra.mxu0 %v192_v16  ;;  %v1171_v16 = vld [vmem:[%s2184_s26] ss:$0 sm:$0xff] }
  0x93   :  { %1329 = vmatmul.mubr.f32.vlgmr.msra.gmra.mxu0 %v191_v17  ;;  %1372 = vmatprep.subr.bf16.mxu0 %v1852_v18 }
  0x94   :  { %1374 = vmatprep.mubr.msk.bf16.mxu0 %vm1853_vm0, %v1852_v18 }
 0x153   :  { %v1330_v19 = vpop.f32.mrf.mxu0 }
 0x155   :  { %v274_v20 = vpop.f32.mrf.mxu0 }
 0x156   :  { %v283_v21 = vpack.c.bf16 %v1330_v19, %v274_v20 }
 0x158   :  { %1332 = vmatpush3.bf16.msra.mxu1 %v283_v21 }
 0x159   :  { %1337 = vmatprep.subr.mxu1 %v402_v32 }
 0x15b   :  { %1334 = vmatmul.mubr.msk.bf16.vlgmr.msra.gmra.mxu1 %vm296_vm1, %v2035_v22 }
 0x15c   :  { %1338 = vmatpush3.msra.mxu1 %v402_v32 }
 0x15d   :  { %1339 = vmatprep.subr.mxu1 %v401_v33 }
 0x15e   :  { %1340 = vmatpush3.msra.mxu1 %v401_v33 }
 0x15f   :  { %1341 = vmatprep.subr.mxu1 %v400_v47 }
 0x160   :  { %1342 = vmatpush3.msra.mxu1 %v400_v47  ;;  %v579_v47 = vld [vmem:[#allocation10 + $0x30] sm:$0xff] }
 0x161   :  { %1343 = vmatprep.subr.mxu1 %v399_v48 }
 0x162   :  { %1344 = vmatpush3.msra.mxu1 %v399_v48  ;;  %v578_v48 = vld [vmem:[#allocation10 + $0x28] sm:$0xff] }
 0x163   :  { %1345 = vmatprep.subr.mxu1 %v398_v49 }
 0x164   :  { %1346 = vmatpush3.msra.mxu1 %v398_v49  ;;  %v577_v49 = vld [vmem:[#allocation10 + $0x20] sm:$0xff] }
 0x165   :  { %1347 = vmatprep.subr.mxu1 %v397_v50 }
 0x166   :  { %1348 = vmatpush3.msra.mxu1 %v397_v50  ;;  %v576_v50 = vld [vmem:[#allocation10 + $0x18] sm:$0xff] }
 0x167   :  { %1349 = vmatprep.subr.mxu1 %v396_v51 }
 0x168   :  { %1350 = vmatpush3.msra.mxu1 %v396_v51  ;;  %v575_v51 = vld [vmem:[#allocation10 + $0x10] sm:$0xff] }
 0x169   :  { %1351 = vmatprep.subr.mxu1 %v395_v52 }
 0x16a   :  { %1352 = vmatpush3.msra.mxu1 %v395_v52  ;;  %v574_v52 = vld [vmem:[#allocation10 + $0x8] sm:$0xff] }
 0x16b   :  { %1353 = vmatprep.subr.mxu1 %v394_v53 }
 0x16c   :  { %1354 = vmatpush3.msra.mxu1 %v394_v53  ;;  %v573_v53 = vld [vmem:[#allocation10] sm:$0xff] }
 0x16d   :  { %1355 = vmatprep.subr.mxu1 %v393_v54 }
 0x16e   :  { %1356 = vmatpush3.msra.mxu1 %v393_v54 }
 0x16f   :  { %1357 = vmatprep.subr.mxu1 %v392_v55 }
 0x170   :  { %1358 = vmatpush3.msra.mxu1 %v392_v55 }
 0x171   :  { %1359 = vmatprep.subr.mxu1 %v391_v56 }
 0x172   :  { %1360 = vmatpush3.msra.mxu1 %v391_v56 }
 0x173   :  { %1361 = vmatprep.subr.mxu1 %v390_v57 }
 0x174   :  { %1362 = vmatpush3.msra.mxu1 %v390_v57 }
 0x175   :  { %1363 = vmatprep.subr.mxu1 %v389_v58 }
 0x176   :  { %1364 = vmatpush3.msra.mxu1 %v389_v58 }
 0x177   :  { %1365 = vmatprep.subr.mxu1 %v388_v59 }
 0x178   :  { %1366 = vmatpush3.msra.mxu1 %v388_v59 }
 0x179   :  { %1367 = vmatprep.subr.mxu1 %v387_v60 }
 0x17a   :  { %1368 = vmatpush3.msra.mxu1 %v387_v60 }
 0x17b   :  { %1413 = vmatprep.subr.bf16.mxu1 %v1852_v18 }
 0x21b   :  { %v334_v24 = vpop.f32.mrf.mxu1 }
 0x21c   :  { %v335_v25 = vadd.f32 %v1166_v23, %v334_v24 }
 0x21d   :  { %v1335_v26 = vpop.f32.mrf.mxu1 }
 0x21e   :  { %v341_v27 = vmax.f32 %v335_v25, 0.0  ;;  %v588_v26 = vld [vmem:[#allocation10 + $0x78] sm:$0xff] }
 0x21f   :  { %v337_v28 = vpop.f32.mrf.mxu1 }
 0x220   :  { %343 = vst [vmem:[#allocation17] sm:$0xff] %v341_v27  ;;  %v338_v29 = vadd.f32 %v1166_v23, %v337_v28  ;;  %345 = vadd.xlane.f32.xlu0 %v341_v27 }
 0x221   :  { %v1336_v30 = vpop.f32.mrf.mxu1 }
 0x222   :  { %v342_v31 = vmax.f32 %v338_v29, 0.0 }
 0x224   :  { %344 = vst [vmem:[#allocation17 + $0x8] sm:$0xff] %v342_v31  ;;  %347 = vadd.xlane.f32.xlu0 %v342_v31 }
 0x2a9   :  { %v346_v36 = vpop.xlane.xlu0 %345 }
 0x2aa   :  { %v349_v37 = vmul.f32 0.03125, %v346_v36 }
 0x2ac   :  { %v351_v39 = vsub.f32 %v341_v27, %v349_v37  ;;  %v587_v27 = vld [vmem:[#allocation10 + $0x70] sm:$0xff] }
 0x2ad   :  { %v348_v40 = vpop.xlane.xlu0 %347 }
 0x2ae   :  { %v350_v41 = vmul.f32 0.03125, %v348_v40  ;;  %v353_v42 = vmul.f32 %v2046_v38, %v351_v39  ;;  %v586_v40 = vld [vmem:[#allocation10 + $0x68] sm:$0xff] }
 0x2b0   :  { %v352_v43 = vsub.f32 %v342_v31, %v350_v41  ;;  %v355_v44 = vmul.f32 %v353_v42, %v353_v42  ;;  %v585_v41 = vld [vmem:[#allocation10 + $0x60] sm:$0xff] }
 0x2b2   :  { %357 = vadd.xlane.f32.xlu1 %v355_v44  ;;  %v354_v45 = vmul.f32 %v2046_v38, %v352_v43  ;;  %v583_v43 = vld [vmem:[#allocation10 + $0x50] sm:$0xff]  ;;  %v582_v44 = vld [vmem:[#allocation10 + $0x48] sm:$0xff] }
 0x2b4   :  { %v356_v46 = vmul.f32 %v354_v45, %v354_v45 }
 0x2b6   :  { %359 = vadd.xlane.f32.xlu1 %v356_v46  ;;  %v580_v46 = vld [vmem:[#allocation10 + $0x38] sm:$0xff] }
 0x33b   :  { %v358_v61 = vpop.xlane.xlu1 %357 }
 0x33c   :  { %v361_v62 = vmul.f32 0.03125, %v358_v61  ;;  %v1173_v61 = vld [vmem:[%s2185_s10] ss:$0 sm:$0xff] }
 0x33e   :  { %v363_v63 = vadd.f32 1e-05, %v361_v62 }
 0x33f   :  { %v360_v0 = vpop.xlane.xlu1 %359 }
 0x340   :  { %1544 = vrsqrt.f32 %v363_v63  ;;  %v362_v1 = vmul.f32 0.03125, %v360_v0  ;;  %v1174_v63 = vld [vmem:[%s2152_s9] ss:$0 sm:$0xff] }
 0x342   :  { %v364_v2 = vadd.f32 1e-05, %v362_v1 }
 0x344   :  { %1546 = vrsqrt.f32 %v364_v2 }
 0x34d   :  { %v1545_v3 = vpop.eup %1544 }
 0x34e   :  { %v367_v5 = vmul.f32 %v1545_v3, %v353_v42  ;;  %v584_v42 = vld [vmem:[#allocation10 + $0x58] sm:$0xff] }
 0x350   :  { %v376_v7 = vmul.f32 %v1169_v4, %v367_v5 }
 0x351   :  { %v1547_v8 = vpop.eup %1546 }
 0x352   :  { %v368_v9 = vmul.f32 %v1547_v8, %v354_v45  ;;  %v385_v10 = vadd.f32 %v1170_v6, %v376_v7  ;;  %v581_v45 = vld [vmem:[#allocation10 + $0x40] sm:$0xff] }
 0x354   :  { %v377_v11 = vmul.f32 %v1169_v4, %v368_v9  ;;  %1369 = vmatprep.mubr.f32.mxu1 %v385_v10  ;;  %v1175_v9 = vld [vmem:[%s2154_s11] ss:$0 sm:$0xff] }
 0x356   :  { %v386_v12 = vadd.f32 %v1170_v6, %v377_v11 }
 0x358   :  { %1370 = vmatmul.mubr.f32.vlgmr.msra.gmra.mxu1 %v386_v12 }
 0x359   :  { %1415 = vmatprep.mubr.msk.bf16.mxu1 %vm1853_vm0, %v1852_v18 }
 0x418   :  { %v1371_v13 = vpop.f32.mrf.mxu1 }
 0x41a   :  { %v469_v14 = vpop.f32.mrf.mxu1 }
 0x41b   :  { %v478_v15 = vpack.c.bf16 %v1371_v13, %v469_v14 }
 0x41d   :  { %1373 = vmatpush3.bf16.msra.mxu0 %v478_v15 }
 0x41e   :  { %1378 = vmatprep.subr.mxu0 %v588_v26 }
 0x420   :  { %1375 = vmatmul.mubr.msk.bf16.vlgmr.msra.gmra.mxu0 %vm296_vm1, %v2035_v22 }
 0x421   :  { %1379 = vmatpush3.msra.mxu0 %v588_v26 }
 0x422   :  { %1380 = vmatprep.subr.mxu0 %v587_v27 }
 0x423   :  { %1381 = vmatpush3.msra.mxu0 %v587_v27 }
 0x424   :  { %1382 = vmatprep.subr.mxu0 %v586_v40 }
 0x425   :  { %1383 = vmatpush3.msra.mxu0 %v586_v40  ;;  %v765_v40 = vld [vmem:[#allocation11 + $0x20] sm:$0xff] }
 0x426   :  { %1384 = vmatprep.subr.mxu0 %v585_v41 }
 0x427   :  { %1385 = vmatpush3.msra.mxu0 %v585_v41  ;;  %v764_v41 = vld [vmem:[#allocation11 + $0x18] sm:$0xff] }
 0x428   :  { %1386 = vmatprep.subr.mxu0 %v584_v42 }
 0x429   :  { %1387 = vmatpush3.msra.mxu0 %v584_v42  ;;  %v763_v42 = vld [vmem:[#allocation11 + $0x10] sm:$0xff] }
 0x42a   :  { %1388 = vmatprep.subr.mxu0 %v583_v43 }
 0x42b   :  { %1389 = vmatpush3.msra.mxu0 %v583_v43  ;;  %v762_v43 = vld [vmem:[#allocation11 + $0x8] sm:$0xff] }
 0x42c   :  { %1390 = vmatprep.subr.mxu0 %v582_v44 }
 0x42d   :  { %1391 = vmatpush3.msra.mxu0 %v582_v44  ;;  %v761_v44 = vld [vmem:[#allocation11] sm:$0xff] }
 0x42e   :  { %1392 = vmatprep.subr.mxu0 %v581_v45 }
 0x42f   :  { %1393 = vmatpush3.msra.mxu0 %v581_v45  ;;  %v874_v45 = vld [vmem:[#allocation13 + $0x78] sm:$0xff] }
 0x430   :  { %1394 = vmatprep.subr.mxu0 %v580_v46 }
 0x431   :  { %1395 = vmatpush3.msra.mxu0 %v580_v46  ;;  %v873_v46 = vld [vmem:[#allocation13 + $0x70] sm:$0xff] }
 0x432   :  { %1396 = vmatprep.subr.mxu0 %v579_v47 }
 0x433   :  { %1397 = vmatpush3.msra.mxu0 %v579_v47  ;;  %v872_v47 = vld [vmem:[#allocation13 + $0x68] sm:$0xff] }
 0x434   :  { %1398 = vmatprep.subr.mxu0 %v578_v48 }
 0x435   :  { %1399 = vmatpush3.msra.mxu0 %v578_v48  ;;  %v871_v48 = vld [vmem:[#allocation13 + $0x60] sm:$0xff] }
 0x436   :  { %1400 = vmatprep.subr.mxu0 %v577_v49 }
 0x437   :  { %1401 = vmatpush3.msra.mxu0 %v577_v49  ;;  %v870_v49 = vld [vmem:[#allocation13 + $0x58] sm:$0xff] }
 0x438   :  { %1402 = vmatprep.subr.mxu0 %v576_v50 }
 0x439   :  { %1403 = vmatpush3.msra.mxu0 %v576_v50  ;;  %v869_v50 = vld [vmem:[#allocation13 + $0x50] sm:$0xff] }
 0x43a   :  { %1404 = vmatprep.subr.mxu0 %v575_v51 }
 0x43b   :  { %1405 = vmatpush3.msra.mxu0 %v575_v51  ;;  %v868_v51 = vld [vmem:[#allocation13 + $0x48] sm:$0xff] }
 0x43c   :  { %1406 = vmatprep.subr.mxu0 %v574_v52 }
 0x43d   :  { %1407 = vmatpush3.msra.mxu0 %v574_v52  ;;  %v867_v52 = vld [vmem:[#allocation13 + $0x40] sm:$0xff] }
 0x43e   :  { %1408 = vmatprep.subr.mxu0 %v573_v53 }
 0x43f   :  { %1409 = vmatpush3.msra.mxu0 %v573_v53  ;;  %v866_v53 = vld [vmem:[#allocation13 + $0x38] sm:$0xff] }
 0x440   :  { %1454 = vmatprep.subr.mxu0 %v874_v45 }
 0x4e0   :  { %v520_v17 = vpop.f32.mrf.mxu0 }
 0x4e1   :  { %v521_v19 = vadd.f32 %v1171_v16, %v520_v17 }
 0x4e2   :  { %v1376_v20 = vpop.f32.mrf.mxu0 }
 0x4e3   :  { %v527_v21 = vmax.f32 %v521_v19, 0.0  ;;  %v776_v19 = vld [vmem:[#allocation11 + $0x78] sm:$0xff] }
 0x4e4   :  { %v523_v23 = vpop.f32.mrf.mxu0 }
 0x4e5   :  { %529 = vst [vmem:[#allocation19] sm:$0xff] %v527_v21  ;;  %v524_v24 = vadd.f32 %v1171_v16, %v523_v23  ;;  %531 = vadd.xlane.f32.xlu0 %v527_v21 }
 0x4e6   :  { %v1377_v18 = vpop.f32.mrf.mxu0 }
 0x4e7   :  { %v528_v25 = vmax.f32 %v524_v24, 0.0 }
 0x4e9   :  { %530 = vst [vmem:[#allocation19 + $0x8] sm:$0xff] %v528_v25  ;;  %533 = vadd.xlane.f32.xlu1 %v528_v25 }
 0x56e   :  { %v532_v28 = vpop.xlane.xlu0 %531 }
 0x56f   :  { %v535_v29 = vmul.f32 0.03125, %v532_v28 }
 0x571   :  { %v537_v30 = vsub.f32 %v527_v21, %v535_v29 }
 0x572   :  { %v534_v31 = vpop.xlane.xlu1 %533 }
 0x573   :  { %v536_v32 = vmul.f32 0.03125, %v534_v31  ;;  %v539_v33 = vmul.f32 %v2046_v38, %v537_v30  ;;  %v774_v30 = vld [vmem:[#allocation11 + $0x68] sm:$0xff]  ;;  %v773_v31 = vld [vmem:[#allocation11 + $0x60] sm:$0xff] }
 0x575   :  { %v538_v34 = vsub.f32 %v528_v25, %v536_v32  ;;  %v541_v36 = vmul.f32 %v539_v33, %v539_v33  ;;  %v772_v32 = vld [vmem:[#allocation11 + $0x58] sm:$0xff] }
 0x577   :  { %543 = vadd.xlane.f32.xlu0 %v541_v36  ;;  %v540_v37 = vmul.f32 %v2046_v38, %v538_v34  ;;  %v770_v34 = vld [vmem:[#allocation11 + $0x48] sm:$0xff]  ;;  %v768_v36 = vld [vmem:[#allocation11 + $0x38] sm:$0xff] }
 0x579   :  { %v542_v39 = vmul.f32 %v540_v37, %v540_v37 }
 0x57b   :  { %545 = vadd.xlane.f32.xlu1 %v542_v39  ;;  %v766_v39 = vld [vmem:[#allocation11 + $0x28] sm:$0xff] }
 0x600   :  { %v544_v54 = vpop.xlane.xlu0 %543 }
 0x601   :  { %v547_v55 = vmul.f32 0.03125, %v544_v54  ;;  %v865_v54 = vld [vmem:[#allocation13 + $0x30] sm:$0xff] }
 0x603   :  { %v549_v56 = vadd.f32 1e-05, %v547_v55  ;;  %v864_v55 = vld [vmem:[#allocation13 + $0x28] sm:$0xff] }
 0x604   :  { %v546_v57 = vpop.xlane.xlu1 %545 }
 0x605   :  { %1548 = vrsqrt.f32 %v549_v56  ;;  %v548_v58 = vmul.f32 0.03125, %v546_v57  ;;  %v863_v56 = vld [vmem:[#allocation13 + $0x20] sm:$0xff]  ;;  %v862_v57 = vld [vmem:[#allocation13 + $0x18] sm:$0xff] }
 0x607   :  { %v550_v59 = vadd.f32 1e-05, %v548_v58 }
 0x609   :  { %1550 = vrsqrt.f32 %v550_v59 }
 0x612   :  { %v1549_v60 = vpop.eup %1548 }
 0x613   :  { %v553_v62 = vmul.f32 %v1549_v60, %v539_v33  ;;  %v771_v33 = vld [vmem:[#allocation11 + $0x50] sm:$0xff] }
 0x615   :  { %v562_v0 = vmul.f32 %v1173_v61, %v553_v62 }
 0x616   :  { %v1551_v1 = vpop.eup %1550 }
 0x617   :  { %v554_v2 = vmul.f32 %v1551_v1, %v540_v37  ;;  %v571_v3 = vadd.f32 %v1174_v63, %v562_v0  ;;  %v767_v37 = vld [vmem:[#allocation11 + $0x30] sm:$0xff]  ;;  %v1177_v1 = vld [vmem:[%s2155_s12] ss:$0 sm:$0xff] }
 0x619   :  { %v563_v4 = vmul.f32 %v1173_v61, %v554_v2  ;;  %1410 = vmatprep.mubr.f32.mxu0 %v571_v3  ;;  %v1178_v3 = vld [vmem:[%s2156_s13] ss:$0 sm:$0xff] }
 0x61b   :  { %v572_v5 = vadd.f32 %v1174_v63, %v563_v4 }
 0x61d   :  { %1411 = vmatmul.mubr.f32.vlgmr.msra.gmra.mxu0 %v572_v5 }
 0x61e   :  { %1455 = vmatpush3.msra.mxu0 %v874_v45 }
 0x61f   :  { %1456 = vmatprep.subr.mxu0 %v873_v46 }
 0x620   :  { %1457 = vmatpush3.msra.mxu0 %v873_v46 }
 0x621   :  { %1458 = vmatprep.subr.mxu0 %v872_v47 }
 0x622   :  { %1459 = vmatpush3.msra.mxu0 %v872_v47 }
 0x623   :  { %1460 = vmatprep.subr.mxu0 %v871_v48 }
 0x624   :  { %1461 = vmatpush3.msra.mxu0 %v871_v48 }
 0x625   :  { %1462 = vmatprep.subr.mxu0 %v870_v49 }
 0x626   :  { %1463 = vmatpush3.msra.mxu0 %v870_v49 }
 0x627   :  { %1464 = vmatprep.subr.mxu0 %v869_v50 }
 0x628   :  { %1465 = vmatpush3.msra.mxu0 %v869_v50 }
 0x629   :  { %1466 = vmatprep.subr.mxu0 %v868_v51 }
 0x62a   :  { %1467 = vmatpush3.msra.mxu0 %v868_v51 }
 0x62b   :  { %1468 = vmatprep.subr.mxu0 %v867_v52 }
 0x62c   :  { %1469 = vmatpush3.msra.mxu0 %v867_v52 }
 0x62d   :  { %1470 = vmatprep.subr.mxu0 %v866_v53 }
 0x62e   :  { %1471 = vmatpush3.msra.mxu0 %v866_v53 }
 0x62f   :  { %1472 = vmatprep.subr.mxu0 %v865_v54 }
 0x630   :  { %1473 = vmatpush3.msra.mxu0 %v865_v54 }
 0x631   :  { %1474 = vmatprep.subr.mxu0 %v864_v55 }
 0x632   :  { %1475 = vmatpush3.msra.mxu0 %v864_v55 }
 0x633   :  { %1476 = vmatprep.subr.mxu0 %v863_v56 }
 0x634   :  { %1477 = vmatpush3.msra.mxu0 %v863_v56 }
 0x635   :  { %1478 = vmatprep.subr.mxu0 %v862_v57 }
 0x636   :  { %1479 = vmatpush3.msra.mxu0 %v862_v57 }
 0x6dd   :  { %v1412_v6 = vpop.f32.mrf.mxu0 }
 0x6df   :  { %v655_v7 = vpop.f32.mrf.mxu0 }
 0x6e0   :  { %v664_v8 = vpack.c.bf16 %v1412_v6, %v655_v7 }
 0x6e2   :  { %1414 = vmatpush3.bf16.msra.mxu1 %v664_v8 }
 0x6e3   :  { %1419 = vmatprep.subr.mxu1 %v776_v19 }
 0x6e5   :  { %1416 = vmatmul.mubr.msk.bf16.vlgmr.msra.gmra.mxu1 %vm296_vm1, %v2035_v22  ;;  %v775_v22 = vld [vmem:[#allocation11 + $0x70] sm:$0xff] }
 0x6e6   :  { %1420 = vmatpush3.msra.mxu1 %v776_v19  ;;  %v967_v19 = vld [vmem:[#allocation14 + $0x50] sm:$0xff] }
 0x6e7   :  { %1421 = vmatprep.subr.mxu1 %v775_v22 }
 0x6e8   :  { %1422 = vmatpush3.msra.mxu1 %v775_v22  ;;  %v966_v22 = vld [vmem:[#allocation14 + $0x48] sm:$0xff] }
 0x6e9   :  { %1423 = vmatprep.subr.mxu1 %v774_v30 }
 0x6ea   :  { %1424 = vmatpush3.msra.mxu1 %v774_v30 }
 0x6eb   :  { %1425 = vmatprep.subr.mxu1 %v773_v31 }
 0x6ec   :  { %1426 = vmatpush3.msra.mxu1 %v773_v31  ;;  %v959_v31 = vld [vmem:[#allocation14 + $0x10] sm:$0xff] }
 0x6ed   :  { %1427 = vmatprep.subr.mxu1 %v772_v32 }
 0x6ee   :  { %1428 = vmatpush3.msra.mxu1 %v772_v32  ;;  %v958_v32 = vld [vmem:[#allocation14 + $0x8] sm:$0xff] }
 0x6ef   :  { %1429 = vmatprep.subr.mxu1 %v771_v33 }
 0x6f0   :  { %1430 = vmatpush3.msra.mxu1 %v771_v33  ;;  %v957_v33 = vld [vmem:[#allocation14] sm:$0xff] }
 0x6f1   :  { %1431 = vmatprep.subr.mxu1 %v770_v34 }
 0x6f2   :  { %1432 = vmatpush3.msra.mxu1 %v770_v34 }
 0x7a5   :  { %v706_v10 = vpop.f32.mrf.mxu1 }
 0x7a6   :  { %v707_v11 = vadd.f32 %v1175_v9, %v706_v10  ;;  %v861_v10 = vld [vmem:[#allocation13 + $0x10] sm:$0xff] }
 0x7a7   :  { %v1417_v12 = vpop.f32.mrf.mxu1  ;;  %1480 = vmatprep.subr.mxu0 %v861_v10 }
 0x7a8   :  { %v713_v13 = vmax.f32 %v707_v11, 0.0  ;;  %717 = vst [vmem:[#allocation16] sm:$0xff] %v707_v11  ;;  %1481 = vmatpush3.msra.mxu0 %v861_v10  ;;  %v860_v11 = vld [vmem:[#allocation13 + $0x8] sm:$0xff]  ;;  %v859_v12 = vld [vmem:[#allocation13] sm:$0xff] }
 0x7a9   :  { %v709_v14 = vpop.f32.mrf.mxu1  ;;  %1482 = vmatprep.subr.mxu0 %v860_v11 }
 0x7aa   :  { %715 = vst [vmem:[#allocation20] sm:$0xff] %v713_v13  ;;  %v710_v15 = vadd.f32 %v1175_v9, %v709_v14  ;;  %719 = vadd.xlane.f32.xlu0 %v713_v13  ;;  %1483 = vmatpush3.msra.mxu0 %v860_v11  ;;  %v971_v14 = vld [vmem:[#allocation14 + $0x70] sm:$0xff] }
 0x7ab   :  { %v1418_v16 = vpop.f32.mrf.mxu1  ;;  %1484 = vmatprep.subr.mxu0 %v859_v12 }
 0x7ac   :  { %v714_v17 = vmax.f32 %v710_v15, 0.0  ;;  %718 = vst [vmem:[#allocation16 + $0x8] sm:$0xff] %v710_v15  ;;  %1485 = vmatpush3.msra.mxu0 %v859_v12  ;;  %v970_v15 = vld [vmem:[#allocation14 + $0x68] sm:$0xff]  ;;  %v969_v16 = vld [vmem:[#allocation14 + $0x60] sm:$0xff] }
 0x7ae   :  { %716 = vst [vmem:[#allocation20 + $0x8] sm:$0xff] %v714_v17  ;;  %721 = vadd.xlane.f32.xlu1 %v714_v17 }
 0x833   :  { %v720_v20 = vpop.xlane.xlu0 %719 }
 0x834   :  { %v723_v21 = vmul.f32 0.03125, %v720_v20  ;;  %v965_v20 = vld [vmem:[#allocation14 + $0x40] sm:$0xff] }
 0x836   :  { %v725_v23 = vsub.f32 %v713_v13, %v723_v21  ;;  %v972_v13 = vld [vmem:[#allocation14 + $0x78] sm:$0xff] }
 0x837   :  { %v722_v24 = vpop.xlane.xlu1 %721  ;;  %v964_v21 = vld [vmem:[#allocation14 + $0x38] sm:$0xff] }
 0x838   :  { %v724_v18 = vmul.f32 0.03125, %v722_v24  ;;  %v2078_v25 = vmul.f32 %v2046_v38, %v725_v23  ;;  %v963_v23 = vld [vmem:[#allocation14 + $0x30] sm:$0xff]  ;;  %v962_v24 = vld [vmem:[#allocation14 + $0x28] sm:$0xff] }
 0x83a   :  { %v726_v26 = vsub.f32 %v714_v17, %v724_v18  ;;  %v729_v27 = vmul.f32 %v2078_v25, %v2078_v25  ;;  %v968_v17 = vld [vmem:[#allocation14 + $0x58] sm:$0xff]  ;;  %v961_v18 = vld [vmem:[#allocation14 + $0x20] sm:$0xff] }
 0x83c   :  { %731 = vadd.xlane.f32.xlu0 %v729_v27  ;;  %v2083_v28 = vmul.f32 %v2046_v38, %v726_v26  ;;  %v769_v38 = vld [vmem:[#allocation11 + $0x40] sm:$0xff]  ;;  %v1179_v27 = vld [vmem:[%s2158_s15] ss:$0 sm:$0xff] }
 0x83d   :  { %1433 = vmatprep.subr.mxu1 %v769_v38 }
 0x83e   :  { %v730_v29 = vmul.f32 %v2083_v28, %v2083_v28  ;;  %1434 = vmatpush3.msra.mxu1 %v769_v38  ;;  %v1180_v38 = vld [vmem:[%s2160_s17] ss:$0 sm:$0xff]  ;;  %s1854_s17 = smov [#allocation17]  }
 0x83f   :  { %1435 = vmatprep.subr.mxu1 %v768_v36 }
 0x840   :  { %733 = vadd.xlane.f32.xlu1 %v730_v29  ;;  %1436 = vmatpush3.msra.mxu1 %v768_v36 }
 0x841   :  { %1437 = vmatprep.subr.mxu1 %v767_v37 }
 0x842   :  { %1438 = vmatpush3.msra.mxu1 %v767_v37 }
 0x843   :  { %1439 = vmatprep.subr.mxu1 %v766_v39 }
 0x844   :  { %1440 = vmatpush3.msra.mxu1 %v766_v39 }
 0x845   :  { %1441 = vmatprep.subr.mxu1 %v765_v40 }
 0x846   :  { %1442 = vmatpush3.msra.mxu1 %v765_v40  ;;  %v1181_v40 = vld [vmem:[%s2162_s19] ss:$0 sm:$0xff]  ;;  %s1099_s19 = sshll.u32 %s1854_s17, 4  ;;  %s1100_s19 = int_to_ptr.vmem [resolvable:$true] %s1099_s19 }
 0x847   :  { %1443 = vmatprep.subr.mxu1 %v764_v41  ;;  %s1724_s1 = scalar_lea.vmem %s1100_s19, 256  ;;  %p1729_p13 = scmp.lt.s32.totalorder %s1100_s19, %s1100_s19 }
 0x848   :  { %1444 = vmatpush3.msra.mxu1 %v764_v41  ;;  %p1725_p12 = scmp.ne.s32.totalorder %s1100_s19, %s1724_s1  ;;  %p1730_p0 = scmp.lt.s32.totalorder %s1724_s1, %s1724_s1 }
 0x849   :  { %1445 = vmatprep.subr.mxu1 %v763_v42 }
 0x84a   :  { %1446 = vmatpush3.msra.mxu1 %v763_v42  ;;  %p1731_p1 = por %p1730_p0, %p1729_p13 }
 0x84b   :  { %1447 = vmatprep.subr.mxu1 %v762_v43 }
 0x84c   :  { %1448 = vmatpush3.msra.mxu1 %v762_v43  ;;  %p1732_p2 = pnand %p1731_p1, %p1725_p12 }
 0x84d   :  { %1449 = vmatprep.subr.mxu1 %v761_v44 }
 0x84e   :  { %1450 = vmatpush3.msra.mxu1 %v761_v44 }
 0x84f   :  { %1489 = vmatprep.subr.mxu1 %v972_v13 }
 0x8c5   :  { %v732_v58 = vpop.xlane.xlu0 %731 }
 0x8c6   :  { %v735_v59 = vmul.f32 0.03125, %v732_v58 }
 0x8c8   :  { %v737_v60 = vadd.f32 1e-05, %v735_v59 }
 0x8c9   :  { %v734_v61 = vpop.xlane.xlu1 %733 }
 0x8ca   :  { %1552 = vrsqrt.f32 %v737_v60  ;;  %v736_v62 = vmul.f32 0.03125, %v734_v61 }
 0x8cc   :  { %v738_v63 = vadd.f32 1e-05, %v736_v62 }
 0x8ce   :  { %1554 = vrsqrt.f32 %v738_v63 }
 0x8d7   :  { %v1553_v0 = vpop.eup %1552 }
 0x8d8   :  { %v741_v2 = vmul.f32 %v1553_v0, %v2078_v25  ;;  %v960_v25 = vld [vmem:[#allocation14 + $0x18] sm:$0xff] }
 0x8da   :  { %v750_v4 = vmul.f32 %v1177_v1, %v741_v2 }
 0x8db   :  { %v1555_v5 = vpop.eup %1554 }
 0x8dc   :  { %v742_v6 = vmul.f32 %v1555_v5, %v2083_v28  ;;  %v759_v7 = vadd.f32 %v1178_v3, %v750_v4 }
 0x8de   :  { %v751_v8 = vmul.f32 %v1177_v1, %v742_v6  ;;  %1451 = vmatprep.mubr.f32.mxu1 %v759_v7 }
 0x8e0   :  { %v760_v9 = vadd.f32 %v1178_v3, %v751_v8 }
 0x8e2   :  { %1452 = vmatmul.mubr.f32.vlgmr.msra.gmra.mxu1 %v760_v9 }
 0x8e3   :  { %1490 = vmatpush3.msra.mxu1 %v972_v13 }
 0x8e4   :  { %1491 = vmatprep.subr.mxu1 %v971_v14 }
 0x8e5   :  { %1492 = vmatpush3.msra.mxu1 %v971_v14 }
 0x8e6   :  { %1493 = vmatprep.subr.mxu1 %v970_v15 }
 0x8e7   :  { %1494 = vmatpush3.msra.mxu1 %v970_v15 }
 0x8e8   :  { %1495 = vmatprep.subr.mxu1 %v969_v16 }
 0x8e9   :  { %1496 = vmatpush3.msra.mxu1 %v969_v16 }
 0x8ea   :  { %1497 = vmatprep.subr.mxu1 %v968_v17 }
 0x8eb   :  { %1498 = vmatpush3.msra.mxu1 %v968_v17 }
 0x8ec   :  { %1499 = vmatprep.subr.mxu1 %v967_v19 }
 0x8ed   :  { %1500 = vmatpush3.msra.mxu1 %v967_v19 }
 0x8ee   :  { %1501 = vmatprep.subr.mxu1 %v966_v22 }
 0x8ef   :  { %1502 = vmatpush3.msra.mxu1 %v966_v22 }
 0x8f0   :  { %1503 = vmatprep.subr.mxu1 %v965_v20 }
 0x8f1   :  { %1504 = vmatpush3.msra.mxu1 %v965_v20 }
 0x8f2   :  { %1505 = vmatprep.subr.mxu1 %v964_v21 }
 0x8f3   :  { %1506 = vmatpush3.msra.mxu1 %v964_v21 }
 0x8f4   :  { %1507 = vmatprep.subr.mxu1 %v963_v23 }
 0x8f5   :  { %1508 = vmatpush3.msra.mxu1 %v963_v23 }
 0x8f6   :  { %1509 = vmatprep.subr.mxu1 %v962_v24 }
 0x8f7   :  { %1510 = vmatpush3.msra.mxu1 %v962_v24 }
 0x8f8   :  { %1511 = vmatprep.subr.mxu1 %v961_v18 }
 0x8f9   :  { %1512 = vmatpush3.msra.mxu1 %v961_v18 }
 0x8fa   :  { %1513 = vmatprep.subr.mxu1 %v960_v25 }
 0x8fb   :  { %1514 = vmatpush3.msra.mxu1 %v960_v25 }
 0x8fc   :  { %1515 = vmatprep.subr.mxu1 %v959_v31 }
 0x8fd   :  { %1516 = vmatpush3.msra.mxu1 %v959_v31 }
 0x8fe   :  { %1517 = vmatprep.subr.mxu1 %v958_v32 }
 0x8ff   :  { %1518 = vmatpush3.msra.mxu1 %v958_v32 }
 0x900   :  { %1519 = vmatprep.subr.mxu1 %v957_v33 }
 0x901   :  { %1520 = vmatpush3.msra.mxu1 %v957_v33 }
 0x9a2   :  { %v1453_v26 = vpop.f32.mrf.mxu1 }
 0x9a3   :  { %v856_v30 = vadd.f32 %v1453_v26, %v1179_v27 }
 0x9a4   :  { %v850_v28 = vpop.f32.mrf.mxu1 }
 0x9a5   :  { %v851_v29 = vadd.f32 %v1179_v27, %v850_v28 }
 0x9a7   :  { %1486 = vmatprep.mubr.f32.mxu0 %v851_v29 }
 0x9a8   :  { %1487 = vmatmul.mubr.f32.vlgmr.msra.gmra.mxu0 %v856_v30 }
 0xa68   :  { %v1488_v34 = vpop.f32.mrf.mxu0 }
 0xa69   :  { %v954_v39 = vadd.f32 %v1488_v34, %v1180_v38 }
 0xa6a   :  { %v948_v36 = vpop.f32.mrf.mxu0 }
 0xa6b   :  { %v949_v37 = vadd.f32 %v1180_v38, %v948_v36 }
 0xa6d   :  { %1521 = vmatprep.mubr.f32.mxu1 %v949_v37 }
 0xa6e   :  { %1522 = vmatmul.mubr.f32.vlgmr.msra.gmra.mxu1 %v954_v39 }
 0xb2e   :  { %v1523_v41 = vpop.f32.mrf.mxu1 }
 0xb2f   :  { %v1052_v42 = vadd.f32 %v1523_v41, %v1181_v40 }
 0xb30   :  { %v1046_v43 = vpop.f32.mrf.mxu1 }
 0xb31   :  { %v1047_v44 = vadd.f32 %v1181_v40, %v1046_v43  ;;  %v1059_v45 = vsel %vm1055_vm3, %v1052_v42, -1e+30 }
 0xb32   :  { %1062 = vmax.xlane.f32.xlu1 %v1059_v45 }
 0xb33   :  { %v1058_v46 = vsel %vm1055_vm3, %v1047_v44, -1e+30 }
 0xb34   :  { %1060 = vmax.xlane.f32.xlu0 %v1058_v46 }
 0xbbb   :  { %v1063_v47 = vpop.xlane.xlu1 %1062 }
 0xbbc   :  { %v2105_v48 = vsub.f32 %v1059_v45, %v1063_v47 }
 0xbbd   :  { %v1061_v49 = vpop.xlane.xlu0 %1060 }
 0xbbe   :  { %v1068_v50 = vmul.f32 1.442695, %v2105_v48  ;;  %v2108_v51 = vsub.f32 %v1058_v46, %v1061_v49 }
 0xbc0   :  { %1556 = vpow2.f32 %v1068_v50  ;;  %v1066_v52 = vmul.f32 1.442695, %v2108_v51 }
 0xbc2   :  { %1558 = vpow2.f32 %v1066_v52 }
 0xbcd   :  { %v1557_v35 = vpop.eup %1556 }
 0xbce   :  { %1072 = vadd.xlane.f32.xlu1 %v1557_v35 }
 0xbcf   :  { %v1559_v53 = vpop.eup %1558 }
 0xbd0   :  { %1070 = vadd.xlane.f32.xlu0 %v1559_v53 }
 0xbd1   :  { %1735 = shalt.err (!%p1732_p2)
}
 0xbd2   :  { %1105 = dma.vmem_to_hbm [thread:$0]  %s1100_s19, 256, %s2164_s21, [#allocation18], %s1841_s28, %s1841_s28, %s1842_s6  }
 0xbd3   :  { %s1744_s27 = scalar_lea.vmem %s1124_s4, 256  ;;  %p1749_p4 = scmp.lt.s32.totalorder %s1124_s4, %s1124_s4 }
 0xbd4   :  { %p1745_p3 = scmp.ne.s32.totalorder %s1124_s4, %s1744_s27  ;;  %p1750_p5 = scmp.lt.s32.totalorder %s1744_s27, %s1744_s27 }
 0xbd6   :  { %p1751_p6 = por %p1750_p5, %p1749_p4 }
 0xbd8   :  { %p1752_p7 = pnand %p1751_p6, %p1745_p3 }
 0xbda   :  { %1755 = shalt.err (!%p1752_p7)
}
 0xbdb   :  { %1129 = dma.vmem_to_hbm [thread:$0]  %s1124_s4, 256, %s2166_s23, [#allocation21], %s1841_s28, %s1841_s28, %s1842_s6  }
 0xbdc   :  { %s1856_s14 = smov [#allocation16]   ;;  %s1857_s16 = smov [#allocation19]  }
 0xbdd   :  { %s1087_s2 = sshll.u32 %s1856_s14, 4  ;;  %s1111_s18 = sshll.u32 %s1857_s16, 4  ;;  %s1088_s2 = int_to_ptr.vmem [resolvable:$true] %s1087_s2  ;;  %s1112_s18 = int_to_ptr.vmem [resolvable:$true] %s1111_s18 }
 0xbde   :  { %s1764_s21 = scalar_lea.vmem %s1088_s2, 256  ;;  %p1769_p9 = scmp.lt.s32.totalorder %s1088_s2, %s1088_s2 }
 0xbdf   :  { %p1765_p8 = scmp.ne.s32.totalorder %s1088_s2, %s1764_s21  ;;  %p1770_p10 = scmp.lt.s32.totalorder %s1764_s21, %s1764_s21 }
 0xbe1   :  { %p1771_p11 = por %p1770_p10, %p1769_p9 }
 0xbe3   :  { %p1772_p12 = pnand %p1771_p11, %p1765_p8 }
 0xbe5   :  { %1775 = shalt.err (!%p1772_p12)
}
 0xbe6   :  { %1093 = dma.vmem_to_hbm [thread:$0]  %s1088_s2, 256, %s2163_s20, [#allocation4], %s1841_s28, %s1841_s28, %s1842_s6  }
 0xbe7   :  { %s1784_s23 = scalar_lea.vmem %s1112_s18, 256  ;;  %p1789_p0 = scmp.lt.s32.totalorder %s1112_s18, %s1112_s18 }
 0xbe8   :  { %p1785_p13 = scmp.ne.s32.totalorder %s1112_s18, %s1784_s23  ;;  %p1790_p1 = scmp.lt.s32.totalorder %s1784_s23, %s1784_s23 }
 0xbea   :  { %p1791_p2 = por %p1790_p1, %p1789_p0 }
 0xbec   :  { %p1792_p3 = pnand %p1791_p2, %p1785_p13 }
 0xbee   :  { %1795 = shalt.err (!%p1792_p3)
}
 0xbef   :  { %1117 = dma.vmem_to_hbm [thread:$0]  %s1112_s18, 256, %s2165_s22, [#allocation18], %s1841_s28, %s1841_s28, %s1842_s6  }
 0xbf0   :  { %s1858_s20 = smov [#allocation22]  }
 0xbf1   :  { %s1135_s12 = sshll.u32 %s1858_s20, 4  ;;  %s1136_s12 = int_to_ptr.vmem [resolvable:$true] %s1135_s12 }
 0xbf2   :  { %s1804_s13 = scalar_lea.vmem %s1136_s12, 256  ;;  %p1809_p5 = scmp.lt.s32.totalorder %s1136_s12, %s1136_s12 }
 0xbf3   :  { %p1805_p4 = scmp.ne.s32.totalorder %s1136_s12, %s1804_s13  ;;  %p1810_p6 = scmp.lt.s32.totalorder %s1804_s13, %s1804_s13 }
 0xbf5   :  { %p1811_p7 = por %p1810_p6, %p1809_p5 }
 0xbf7   :  { %p1812_p8 = pnand %p1811_p7, %p1805_p4 }
 0xc57   :  { %v1073_v54 = vpop.xlane.xlu1 %1072 }
 0xc58   :  { %1560 = vlog2.f32 %v1073_v54 }
 0xc59   :  { %v1071_v55 = vpop.xlane.xlu0 %1070 }
 0xc5a   :  { %1562 = vlog2.f32 %v1071_v55 }
 0xc65   :  { %v1561_v56 = vpop.eup %1560 }
 0xc66   :  { %v1077_v57 = vmul.f32 0.6931472, %v1561_v56 }
 0xc67   :  { %v1563_v58 = vpop.eup %1562 }
 0xc68   :  { %v1079_v59 = vsub.f32 %v2105_v48, %v1077_v57  ;;  %v1075_v60 = vmul.f32 0.6931472, %v1563_v58 }
 0xc6a   :  { %1081 = vst [vmem:[#allocation22 + $0x8] sm:$0xff] %v1079_v59  ;;  %v1078_v61 = vsub.f32 %v2108_v51, %v1075_v60 }
 0xc6c   :  { %1080 = vst [vmem:[#allocation22] sm:$0xff] %v1078_v61 }
 0xc6d   :  { %1815 = shalt.err (!%p1812_p8)
}
 0xc6e   :  { %1141 = dma.vmem_to_hbm [thread:$0]  %s1136_s12, 256, %s2167_s24, [#allocation21], %s1841_s28, %s1841_s28, %s1842_s6  }
 0xc6f   :  { %1834 = dma.done.wait [#allocation4], 256  }
 0xc70   :  { %1835 = vsyncadd [#allocation4], 4294967040 }
 0xc71   :  { %1836 = dma.done.wait [#allocation18], 512  }
 0xc72   :  { %1837 = vsyncadd [#allocation18], 4294966784 }
 0xc73   :  { %1838 = dma.done.wait [#allocation21], 512  }
 0xc74   :  { %1839 = vsyncadd [#allocation21], 4294966784 }
 0xc75   :  { %1157 = vsyncpa [#allocation3], 1 }
 0xc76   :  { %1158 = vsyncpa [#allocation6], 1 }
 0xc77   :  { %1159 = vsyncpa [#allocation9], 1 }
 0xc78   :  { %1160 = vsyncpa [#allocation12], 1 }
 0xc79   :  { %1161 = vsyncpa [#allocation15], 1 }
 0xc7a   :  { %1162 = vsyncpa [#allocation4], 1 }
 0xc7b   :  { %1163 = vsyncpa [#allocation18], 1 }
 0xc7c   :  { %1164 = vsyncpa [#allocation21], 1 }

</bundles_post_ra>
